<compile_context>
chip_gen: v7x
topology: tpu7x:2x2x1
jax: 0.10.0
libtpu: 0.0.40
codegen_flags: <defaults>
</compile_context>

<pallas_src>
import numpy as np
import jax
import jax.numpy as jnp
from jax.experimental import pallas as pl
from jax.experimental.pallas import tpu as pltpu

N, H, W = 2, 16, 16
CIN = 8            # in_channels
COUT = 8           # out_channels
CHALF = COUT // 2
SLOPE = 0.2        # relu_slope
EPS = 1e-5         # nn.InstanceNorm2d default eps
HO, WO = H // 2, W // 2
WC = W * COUT      # 128 packed lanes  (lane = w*C + c)
WOC = WO * COUT    # 64 packed lanes of the downsampled output
INV_HW = 1.0 / float(H * W)


def _leaky(x):
    return jnp.where(x >= 0, x, SLOPE * x)


def unet_block_kernel(xp_ref, edp_ref,
                      b1w_ref, b2w_ref, bedw_ref, widw_ref, g_ref, mdw_ref, s_ref,
                      b1_ref, b2_ref, bsk_ref, gam_ref, bet_ref,
                      out_ref, down_ref):
    """One image per grid step:
       conv1 -> HIN -> lrelu -> conv2 -> lrelu -> +identity +csff -> (out, down)."""
    # ---- conv1 and the enc/dec (csff) path: one banded matmul per kh tap ----
    acc1 = jnp.dot(xp_ref[0:H, :], b1w_ref[0], preferred_element_type=jnp.float32)
    accs = jnp.dot(edp_ref[0:H, :], bedw_ref[0], preferred_element_type=jnp.float32)
    for kh in range(1, 3):
        acc1 = acc1 + jnp.dot(xp_ref[kh:kh + H, :], b1w_ref[kh],
                              preferred_element_type=jnp.float32)
        accs = accs + jnp.dot(edp_ref[kh:kh + H, :], bedw_ref[kh],
                              preferred_element_type=jnp.float32)
    conv1 = acc1 + b1_ref[...]

    # ---- HIN: InstanceNorm2d(affine=True) on channels [0, CHALF) ----
    # g_ref sums all lanes of the same channel (over w) and broadcasts the
    # result back to every w position, so the stats stay lane-dense.
    gmat = g_ref[...]
    mean = jnp.dot(jnp.sum(conv1, axis=0, keepdims=True), gmat,
                   preferred_element_type=jnp.float32) * INV_HW
    d = conv1 - mean
    var = jnp.dot(jnp.sum(d * d, axis=0, keepdims=True), gmat,
                  preferred_element_type=jnp.float32) * INV_HW
    normed = d * jax.lax.rsqrt(var + EPS) * gam_ref[...] + bet_ref[...]
    lane = jax.lax.broadcasted_iota(jnp.int32, (1, WC), 1)
    is_hin = jnp.bitwise_and(lane, COUT - 1) < CHALF
    t1 = _leaky(jnp.where(is_hin, normed, conv1))

    # ---- conv2: same banded kw weights; the kh halo is two tiny shift matmuls
    # (no padded scratch, no value slicing / relayouts) ----
    hrow = jax.lax.broadcasted_iota(jnp.int32, (H, H), 0)
    hcol = jax.lax.broadcasted_iota(jnp.int32, (H, H), 1)
    sh_dn = (hrow == hcol + 1).astype(jnp.float32)   # row h <- t1[h-1], zero at h=0
    sh_up = (hrow == hcol - 1).astype(jnp.float32)   # row h <- t1[h+1], zero at h=H-1
    t1_m1 = jnp.dot(sh_dn, t1, preferred_element_type=jnp.float32)
    t1_p1 = jnp.dot(sh_up, t1, preferred_element_type=jnp.float32)
    acc2 = (jnp.dot(t1_m1, b2w_ref[0], preferred_element_type=jnp.float32)
            + jnp.dot(t1, b2w_ref[1], preferred_element_type=jnp.float32)
            + jnp.dot(t1_p1, b2w_ref[2], preferred_element_type=jnp.float32))
    t2 = _leaky(acc2 + b2_ref[...])

    # ---- identity 1x1 conv + skip adds (identity/csff biases pre-summed) ----
    ident = jnp.dot(xp_ref[1:1 + H, :], widw_ref[...],
                    preferred_element_type=jnp.float32)
    out = t2 + ident + accs + bsk_ref[...]
    out_ref[...] = out

    # ---- fused 4x4 / stride-2 / pad-1 downsample (no bias) ----
    down = jnp.dot(jnp.dot(s_ref[0], out, preferred_element_type=jnp.float32),
                   mdw_ref[0], preferred_element_type=jnp.float32)
    for kh in range(1, 4):
        rows = jnp.dot(s_ref[kh], out, preferred_element_type=jnp.float32)
        down = down + jnp.dot(rows, mdw_ref[kh],
                              preferred_element_type=jnp.float32)
    down_ref[...] = down


def _banded(w, band):
    """OIHW conv weight -> per-kh block-banded (Win*CIN, Wout*COUT) matrices.

    band[kw, w_in, w_out] is the 0/1 pattern selecting which input column feeds
    which output column; it also encodes the zero padding along W."""
    taps = jnp.transpose(w, (2, 3, 1, 0))                       # (KH, KW, CIN, COUT)
    bmat = jnp.einsum('kab,hkio->haibo',
                      jnp.asarray(band, jnp.float32), taps)     # (KH, Win, CIN, Wout, COUT)
    return bmat.reshape(w.shape[2], band.shape[1] * w.shape[1],
                        band.shape[2] * w.shape[0])


def unet_conv_block(x, enc, dec, params):
    (w1, b1, w2, b2, wid, bid, gamma, beta, wenc, benc, wdec, bdec, wdown) = params

    # ---- static banding / row-selection patterns (numpy, compile-time) ----
    wi = np.arange(W)[None, :, None]
    band3 = (wi == np.arange(W)[None, None, :] + np.arange(3)[:, None, None] - 1)
    band4 = (wi == 2 * np.arange(WO)[None, None, :] + np.arange(4)[:, None, None] - 1)
    sel = (np.arange(H)[None, None, :] ==
           2 * np.arange(HO)[None, :, None] + np.arange(4)[:, None, None] - 1)
    S = jnp.asarray(sel, jnp.float32)                                       # (4, HO, H)
    Gm = jnp.asarray(np.kron(np.ones((W, W), np.float32),
                             np.eye(COUT, dtype=np.float32)))               # (WC, WC)

    # ---- weight plumbing: banded / block-diagonal matrices, packed biases ----
    B1 = _banded(w1, band3)                                                 # (3, WC, WC)
    B2 = _banded(w2, band3)                                                 # (3, WC, WC)
    BED = jnp.concatenate([_banded(wenc, band3), _banded(wdec, band3)],
                          axis=1)                                           # (3, 2*WC, WC)
    Md = _banded(wdown, band4)                                              # (4, WC, WOC)
    Wid = jnp.kron(jnp.eye(W, dtype=jnp.float32), wid[:, :, 0, 0].T)        # (WC, WC)

    tile = lambda v: jnp.tile(v, W)[None, :]                                # (1, WC)
    b1p, b2p = tile(b1), tile(b2)
    bskp = tile(bid + benc + bdec)                                          # pre-summed
    gamp = tile(jnp.concatenate([gamma, jnp.ones((COUT - CHALF,), jnp.float32)]))
    betp = tile(jnp.concatenate([beta, jnp.zeros((COUT - CHALF,), jnp.float32)]))

    # ---- activations: lane-dense (h, w*C+c) packing, H halo added here ----
    pack = lambda a: a.reshape(N, H, W * a.shape[-1])
    pad_h = lambda a: jnp.pad(a, ((0, 0), (1, 1), (0, 0)))
    xp = pad_h(pack(x))                                                     # (N, H+2, WC)
    edp = pad_h(jnp.concatenate([pack(enc), pack(dec)], axis=-1))           # (N, H+2, 2*WC)

    full = lambda s: pl.BlockSpec(s, lambda n: (0,) * len(s))
    out_pk, down_pk = pl.pallas_call(
        unet_block_kernel,
        out_shape=(jax.ShapeDtypeStruct((N, H, WC), jnp.float32),
                   jax.ShapeDtypeStruct((N, HO, WOC), jnp.float32)),
        grid=(N,),
        in_specs=[
            pl.BlockSpec((None, H + 2, WC), lambda n: (n, 0, 0)),       # xp
            pl.BlockSpec((None, H + 2, 2 * WC), lambda n: (n, 0, 0)),   # enc|dec packed
            full((3, WC, WC)),          # B1
            full((3, WC, WC)),          # B2
            full((3, 2 * WC, WC)),      # BED
            full((WC, WC)),             # identity (block-diagonal)
            full((WC, WC)),             # G  (channel reduce+broadcast)
            full((4, WC, WOC)),         # Md (downsample banded)
            full((4, HO, H)),           # S  (downsample row selection)
            full((1, WC)), full((1, WC)), full((1, WC)),                # b1, b2, skip bias
            full((1, WC)), full((1, WC)),                               # gamma, beta
        ],
        out_specs=(pl.BlockSpec((None, H, WC), lambda n: (n, 0, 0)),
                   pl.BlockSpec((None, HO, WOC), lambda n: (n, 0, 0))),
        compiler_params=pltpu.CompilerParams(
            dimension_semantics=("parallel",)),
    )(xp, edp, B1, B2, BED, Wid, Gm, Md, S, b1p, b2p, bskp, gamp, betp)

    out = out_pk.reshape(N, H, W, COUT)
    out_down = down_pk.reshape(N, HO, WO, COUT)
    return out_down, out


def reference(x, enc, dec, params):
    """Pure-JAX (lax.conv) NHWC reference matching the PyTorch forward."""
    (w1, b1, w2, b2, wid, bid, gamma, beta, wenc, benc, wdec, bdec, wdown) = params

    def conv(a, w, b=None, stride=1, pad=1):
        y = jax.lax.conv_general_dilated(
            a, jnp.transpose(w, (2, 3, 1, 0)), (stride, stride),
            [(pad, pad), (pad, pad)],
            dimension_numbers=("NHWC", "HWIO", "NHWC"))
        return y if b is None else y + b

    out = conv(x, w1, b1)
    o1, o2 = out[..., :CHALF], out[..., CHALF:]
    m = o1.mean(axis=(1, 2), keepdims=True)
    v = ((o1 - m) ** 2).mean(axis=(1, 2), keepdims=True)
    o1 = (o1 - m) * jax.lax.rsqrt(v + EPS) * gamma + beta
    out = _leaky(jnp.concatenate([o1, o2], axis=-1))
    out = _leaky(conv(out, w2, b2))
    out = out + conv(x, wid, bid, pad=0)
    out = out + conv(enc, wenc, benc) + conv(dec, wdec, bdec)
    out_down = conv(out, wdown, None, stride=2, pad=1)
    return out_down, out


if __name__ == "__main__":
    key = jax.random.PRNGKey(0)
    ks = jax.random.split(key, 16)
    f = lambda k, s: jax.random.normal(k, s, jnp.float32) * 0.1

    x = jax.random.normal(ks[0], (N, H, W, CIN), jnp.float32)
    enc = jax.random.normal(ks[1], (N, H, W, COUT), jnp.float32)
    dec = jax.random.normal(ks[2], (N, H, W, COUT), jnp.float32)

    params = (
        f(ks[3], (COUT, CIN, 3, 3)), f(ks[4], (COUT,)),     # conv1
        f(ks[5], (COUT, COUT, 3, 3)), f(ks[6], (COUT,)),    # conv2
        f(ks[7], (COUT, CIN, 1, 1)), f(ks[8], (COUT,)),     # identity 1x1
        1.0 + f(ks[9], (CHALF,)), f(ks[10], (CHALF,)),      # InstanceNorm gamma/beta
        f(ks[11], (COUT, COUT, 3, 3)), f(ks[12], (COUT,)),  # csff_enc
        f(ks[13], (COUT, COUT, 3, 3)), f(ks[14], (COUT,)),  # csff_dec
        f(ks[15], (COUT, CIN, 4, 4)),                       # downsample (bias=False)
    )

    run = jax.jit(unet_conv_block)
    out_down, out = jax.block_until_ready(run(x, enc, dec, params))
    ref_down, ref_out = reference(x, enc, dec, params)

    assert out.shape == (N, H, W, COUT) and out_down.shape == (N, HO, WO, COUT)
    assert jnp.allclose(out, ref_out, atol=1e-4, rtol=1e-4)
    assert jnp.allclose(out_down, ref_down, atol=1e-4, rtol=1e-4)
    print("KERNEL_OK")
</pallas_src>

<mosaic_0001>
module attributes {stable_mosaic.version = 11 : i64} {
  func.func @unet_block_kernel(%arg0: i32, %arg1: memref<1x18x128xf32, #tpu.memory_space<vmem>>, %arg2: memref<1x18x256xf32, #tpu.memory_space<vmem>>, %arg3: memref<3x128x128xf32, #tpu.memory_space<vmem>>, %arg4: memref<3x128x128xf32, #tpu.memory_space<vmem>>, %arg5: memref<3x256x128xf32, #tpu.memory_space<vmem>>, %arg6: memref<128x128xf32, #tpu.memory_space<vmem>>, %arg7: memref<128x128xf32, #tpu.memory_space<vmem>>, %arg8: memref<4x128x64xf32, #tpu.memory_space<vmem>>, %arg9: memref<4x8x16xf32, #tpu.memory_space<vmem>>, %arg10: memref<1x128xf32, #tpu.memory_space<vmem>>, %arg11: memref<1x128xf32, #tpu.memory_space<vmem>>, %arg12: memref<1x128xf32, #tpu.memory_space<vmem>>, %arg13: memref<1x128xf32, #tpu.memory_space<vmem>>, %arg14: memref<1x128xf32, #tpu.memory_space<vmem>>, %arg15: memref<1x16x128xf32, #tpu.memory_space<vmem>>, %arg16: memref<1x8x64xf32, #tpu.memory_space<vmem>>) attributes {dimension_semantics = [#tpu.dimension_semantics<parallel>], iteration_bounds = array<i64: 2>, scalar_prefetch = 0 : i64, scratch_operands = 0 : i64, tpu.core_type = #tpu.core_type<tc>, window_params = [{transform_indices = @transform_0, window_bounds = array<i64: 1, 18, 128>}, {transform_indices = @transform_1, window_bounds = array<i64: 1, 18, 256>}, {pipeline_mode = #tpu.pipeline_mode<synchronous>, transform_indices = @transform_2, window_bounds = array<i64: 3, 128, 128>}, {pipeline_mode = #tpu.pipeline_mode<synchronous>, transform_indices = @transform_3, window_bounds = array<i64: 3, 128, 128>}, {pipeline_mode = #tpu.pipeline_mode<synchronous>, transform_indices = @transform_4, window_bounds = array<i64: 3, 256, 128>}, {pipeline_mode = #tpu.pipeline_mode<synchronous>, transform_indices = @transform_5, window_bounds = array<i64: 128, 128>}, {pipeline_mode = #tpu.pipeline_mode<synchronous>, transform_indices = @transform_6, window_bounds = array<i64: 128, 128>}, {pipeline_mode = #tpu.pipeline_mode<synchronous>, transform_indices = @transform_7, window_bounds = array<i64: 4, 128, 64>}, {pipeline_mode = #tpu.pipeline_mode<synchronous>, transform_indices = @transform_8, window_bounds = array<i64: 4, 8, 16>}, {pipeline_mode = #tpu.pipeline_mode<synchronous>, transform_indices = @transform_9, window_bounds = array<i64: 1, 128>}, {pipeline_mode = #tpu.pipeline_mode<synchronous>, transform_indices = @transform_10, window_bounds = array<i64: 1, 128>}, {pipeline_mode = #tpu.pipeline_mode<synchronous>, transform_indices = @transform_11, window_bounds = array<i64: 1, 128>}, {pipeline_mode = #tpu.pipeline_mode<synchronous>, transform_indices = @transform_12, window_bounds = array<i64: 1, 128>}, {pipeline_mode = #tpu.pipeline_mode<synchronous>, transform_indices = @transform_13, window_bounds = array<i64: 1, 128>}, {transform_indices = @transform_14, window_bounds = array<i64: 1, 16, 128>}, {transform_indices = @transform_15, window_bounds = array<i64: 1, 8, 64>}]} {
    %c0 = arith.constant 0 : index
    %c0_0 = arith.constant 0 : index
    %c0_1 = arith.constant 0 : index
    %0 = vector.load %arg1[%c0, %c0_0, %c0_1] : memref<1x18x128xf32, #tpu.memory_space<vmem>>, vector<1x16x128xf32>
    %1 = vector.shape_cast %0 : vector<1x16x128xf32> to vector<16x128xf32>
    %c0_2 = arith.constant 0 : index
    %c0_3 = arith.constant 0 : index
    %c0_4 = arith.constant 0 : index
    %2 = vector.load %arg3[%c0_2, %c0_3, %c0_4] : memref<3x128x128xf32, #tpu.memory_space<vmem>>, vector<1x128x128xf32>
    %3 = vector.shape_cast %2 : vector<1x128x128xf32> to vector<128x128xf32>
    %cst = arith.constant dense<0.000000e+00> : vector<16x128xf32>
    %4 = tpu.matmul %1, %3, %cst {dimension_numbers = #tpu.dot_dimension_numbers<[1], [0], [0], [1], [0, 0, 1, 1], [], []>} : vector<16x128xf32>, vector<128x128xf32>, vector<16x128xf32> -> vector<16x128xf32>
    %c0_5 = arith.constant 0 : index
    %c0_6 = arith.constant 0 : index
    %c0_7 = arith.constant 0 : index
    %5 = vector.load %arg2[%c0_5, %c0_6, %c0_7] : memref<1x18x256xf32, #tpu.memory_space<vmem>>, vector<1x16x256xf32>
    %6 = vector.shape_cast %5 : vector<1x16x256xf32> to vector<16x256xf32>
    %c0_8 = arith.constant 0 : index
    %c0_9 = arith.constant 0 : index
    %c0_10 = arith.constant 0 : index
    %7 = vector.load %arg5[%c0_8, %c0_9, %c0_10] : memref<3x256x128xf32, #tpu.memory_space<vmem>>, vector<1x256x128xf32>
    %8 = vector.shape_cast %7 : vector<1x256x128xf32> to vector<256x128xf32>
    %cst_11 = arith.constant dense<0.000000e+00> : vector<16x128xf32>
    %9 = tpu.matmul %6, %8, %cst_11 {dimension_numbers = #tpu.dot_dimension_numbers<[1], [0], [0], [1], [0, 0, 1, 1], [], []>} : vector<16x256xf32>, vector<256x128xf32>, vector<16x128xf32> -> vector<16x128xf32>
    %c0_12 = arith.constant 0 : index
    %c1 = arith.constant 1 : index
    %c0_13 = arith.constant 0 : index
    %10 = vector.load %arg1[%c0_12, %c1, %c0_13] : memref<1x18x128xf32, #tpu.memory_space<vmem>>, vector<1x16x128xf32>
    %11 = vector.shape_cast %10 : vector<1x16x128xf32> to vector<16x128xf32>
    %c1_14 = arith.constant 1 : index
    %c0_15 = arith.constant 0 : index
    %c0_16 = arith.constant 0 : index
    %12 = vector.load %arg3[%c1_14, %c0_15, %c0_16] : memref<3x128x128xf32, #tpu.memory_space<vmem>>, vector<1x128x128xf32>
    %13 = vector.shape_cast %12 : vector<1x128x128xf32> to vector<128x128xf32>
    %cst_17 = arith.constant dense<0.000000e+00> : vector<16x128xf32>
    %14 = tpu.matmul %11, %13, %cst_17 {dimension_numbers = #tpu.dot_dimension_numbers<[1], [0], [0], [1], [0, 0, 1, 1], [], []>} : vector<16x128xf32>, vector<128x128xf32>, vector<16x128xf32> -> vector<16x128xf32>
    %15 = arith.addf %4, %14 : vector<16x128xf32>
    %c0_18 = arith.constant 0 : index
    %c1_19 = arith.constant 1 : index
    %c0_20 = arith.constant 0 : index
    %16 = vector.load %arg2[%c0_18, %c1_19, %c0_20] : memref<1x18x256xf32, #tpu.memory_space<vmem>>, vector<1x16x256xf32>
    %17 = vector.shape_cast %16 : vector<1x16x256xf32> to vector<16x256xf32>
    %c1_21 = arith.constant 1 : index
    %c0_22 = arith.constant 0 : index
    %c0_23 = arith.constant 0 : index
    %18 = vector.load %arg5[%c1_21, %c0_22, %c0_23] : memref<3x256x128xf32, #tpu.memory_space<vmem>>, vector<1x256x128xf32>
    %19 = vector.shape_cast %18 : vector<1x256x128xf32> to vector<256x128xf32>
    %cst_24 = arith.constant dense<0.000000e+00> : vector<16x128xf32>
    %20 = tpu.matmul %17, %19, %cst_24 {dimension_numbers = #tpu.dot_dimension_numbers<[1], [0], [0], [1], [0, 0, 1, 1], [], []>} : vector<16x256xf32>, vector<256x128xf32>, vector<16x128xf32> -> vector<16x128xf32>
    %21 = arith.addf %9, %20 : vector<16x128xf32>
    %c0_25 = arith.constant 0 : index
    %c2 = arith.constant 2 : index
    %c0_26 = arith.constant 0 : index
    %22 = vector.load %arg1[%c0_25, %c2, %c0_26] : memref<1x18x128xf32, #tpu.memory_space<vmem>>, vector<1x16x128xf32>
    %23 = vector.shape_cast %22 : vector<1x16x128xf32> to vector<16x128xf32>
    %c2_27 = arith.constant 2 : index
    %c0_28 = arith.constant 0 : index
    %c0_29 = arith.constant 0 : index
    %24 = vector.load %arg3[%c2_27, %c0_28, %c0_29] : memref<3x128x128xf32, #tpu.memory_space<vmem>>, vector<1x128x128xf32>
    %25 = vector.shape_cast %24 : vector<1x128x128xf32> to vector<128x128xf32>
    %cst_30 = arith.constant dense<0.000000e+00> : vector<16x128xf32>
    %26 = tpu.matmul %23, %25, %cst_30 {dimension_numbers = #tpu.dot_dimension_numbers<[1], [0], [0], [1], [0, 0, 1, 1], [], []>} : vector<16x128xf32>, vector<128x128xf32>, vector<16x128xf32> -> vector<16x128xf32>
    %27 = arith.addf %15, %26 : vector<16x128xf32>
    %c0_31 = arith.constant 0 : index
    %c2_32 = arith.constant 2 : index
    %c0_33 = arith.constant 0 : index
    %28 = vector.load %arg2[%c0_31, %c2_32, %c0_33] : memref<1x18x256xf32, #tpu.memory_space<vmem>>, vector<1x16x256xf32>
    %29 = vector.shape_cast %28 : vector<1x16x256xf32> to vector<16x256xf32>
    %c2_34 = arith.constant 2 : index
    %c0_35 = arith.constant 0 : index
    %c0_36 = arith.constant 0 : index
    %30 = vector.load %arg5[%c2_34, %c0_35, %c0_36] : memref<3x256x128xf32, #tpu.memory_space<vmem>>, vector<1x256x128xf32>
    %31 = vector.shape_cast %30 : vector<1x256x128xf32> to vector<256x128xf32>
    %cst_37 = arith.constant dense<0.000000e+00> : vector<16x128xf32>
    %32 = tpu.matmul %29, %31, %cst_37 {dimension_numbers = #tpu.dot_dimension_numbers<[1], [0], [0], [1], [0, 0, 1, 1], [], []>} : vector<16x256xf32>, vector<256x128xf32>, vector<16x128xf32> -> vector<16x128xf32>
    %33 = arith.addf %21, %32 : vector<16x128xf32>
    %c0_38 = arith.constant 0 : index
    %c0_39 = arith.constant 0 : index
    %34 = vector.load %arg10[%c0_38, %c0_39] : memref<1x128xf32, #tpu.memory_space<vmem>>, vector<1x128xf32>
    %35 = vector.broadcast %34 : vector<1x128xf32> to vector<16x128xf32>
    %36 = arith.addf %27, %35 : vector<16x128xf32>
    %c0_40 = arith.constant 0 : index
    %c0_41 = arith.constant 0 : index
    %37 = vector.load %arg7[%c0_40, %c0_41] : memref<128x128xf32, #tpu.memory_space<vmem>>, vector<128x128xf32>
    %cst_42 = arith.constant dense<0.000000e+00> : vector<128xf32>
    %38 = vector.multi_reduction <add>, %36, %cst_42 [0] : vector<16x128xf32> to vector<128xf32>
    %39 = vector.shape_cast %38 : vector<128xf32> to vector<1x128xf32>
    %cst_43 = arith.constant dense<0.000000e+00> : vector<1x128xf32>
    %40 = tpu.matmul %39, %37, %cst_43 {dimension_numbers = #tpu.dot_dimension_numbers<[1], [0], [0], [1], [0, 0, 1, 1], [], []>} : vector<1x128xf32>, vector<128x128xf32>, vector<1x128xf32> -> vector<1x128xf32>
    %cst_44 = arith.constant 3.906250e-03 : f32
    %41 = vector.broadcast %cst_44 : f32 to vector<1x128xf32>
    %42 = arith.mulf %40, %41 : vector<1x128xf32>
    %43 = vector.broadcast %42 : vector<1x128xf32> to vector<16x128xf32>
    %44 = arith.subf %36, %43 : vector<16x128xf32>
    %45 = arith.mulf %44, %44 : vector<16x128xf32>
    %cst_45 = arith.constant dense<0.000000e+00> : vector<128xf32>
    %46 = vector.multi_reduction <add>, %45, %cst_45 [0] : vector<16x128xf32> to vector<128xf32>
    %47 = vector.shape_cast %46 : vector<128xf32> to vector<1x128xf32>
    %cst_46 = arith.constant dense<0.000000e+00> : vector<1x128xf32>
    %48 = tpu.matmul %47, %37, %cst_46 {dimension_numbers = #tpu.dot_dimension_numbers<[1], [0], [0], [1], [0, 0, 1, 1], [], []>} : vector<1x128xf32>, vector<128x128xf32>, vector<1x128xf32> -> vector<1x128xf32>
    %cst_47 = arith.constant 3.906250e-03 : f32
    %49 = vector.broadcast %cst_47 : f32 to vector<1x128xf32>
    %50 = arith.mulf %48, %49 : vector<1x128xf32>
    %cst_48 = arith.constant 9.99999974E-6 : f32
    %51 = vector.broadcast %cst_48 : f32 to vector<1x128xf32>
    %52 = arith.addf %50, %51 : vector<1x128xf32>
    %53 = math.rsqrt %52 : vector<1x128xf32>
    %54 = vector.broadcast %53 : vector<1x128xf32> to vector<16x128xf32>
    %55 = arith.mulf %44, %54 : vector<16x128xf32>
    %c0_49 = arith.constant 0 : index
    %c0_50 = arith.constant 0 : index
    %56 = vector.load %arg13[%c0_49, %c0_50] : memref<1x128xf32, #tpu.memory_space<vmem>>, vector<1x128xf32>
    %57 = vector.broadcast %56 : vector<1x128xf32> to vector<16x128xf32>
    %58 = arith.mulf %55, %57 : vector<16x128xf32>
    %c0_51 = arith.constant 0 : index
    %c0_52 = arith.constant 0 : index
    %59 = vector.load %arg14[%c0_51, %c0_52] : memref<1x128xf32, #tpu.memory_space<vmem>>, vector<1x128xf32>
    %60 = vector.broadcast %59 : vector<1x128xf32> to vector<16x128xf32>
    %61 = arith.addf %58, %60 : vector<16x128xf32>
    %62 = tpu.iota {dimensions = array<i32: 1>} : vector<1x128xi32>
    %c7_i32 = arith.constant 7 : i32
    %63 = vector.broadcast %c7_i32 : i32 to vector<1x128xi32>
    %64 = arith.andi %62, %63 : vector<1x128xi32>
    %c4_i32 = arith.constant 4 : i32
    %65 = vector.broadcast %c4_i32 : i32 to vector<1x128xi32>
    %66 = arith.cmpi slt, %64, %65 : vector<1x128xi32>
    %67 = vector.shape_cast %66 : vector<1x128xi1> to vector<1x128xi1>
    %68 = vector.broadcast %67 : vector<1x128xi1> to vector<16x128xi1>
    %69 = arith.select %68, %61, %36 : vector<16x128xi1>, vector<16x128xf32>
    %cst_53 = arith.constant 0.000000e+00 : f32
    %70 = vector.broadcast %cst_53 : f32 to vector<16x128xf32>
    %71 = arith.cmpf oge, %69, %70 : vector<16x128xf32>
    %cst_54 = arith.constant 2.000000e-01 : f32
    %72 = vector.broadcast %cst_54 : f32 to vector<16x128xf32>
    %73 = arith.mulf %72, %69 : vector<16x128xf32>
    %74 = arith.select %71, %69, %73 : vector<16x128xi1>, vector<16x128xf32>
    %75 = tpu.iota {dimensions = array<i32: 0>} : vector<16x16xi32>
    %76 = tpu.iota {dimensions = array<i32: 1>} : vector<16x16xi32>
    %c1_i32 = arith.constant 1 : i32
    %77 = vector.broadcast %c1_i32 : i32 to vector<16x16xi32>
    %78 = arith.addi %76, %77 : vector<16x16xi32>
    %79 = arith.cmpi eq, %75, %78 : vector<16x16xi32>
    %80 = arith.extui %79 : vector<16x16xi1> to vector<16x16xi32>
    %81 = arith.sitofp %80 : vector<16x16xi32> to vector<16x16xf32>
    %c1_i32_55 = arith.constant 1 : i32
    %82 = vector.broadcast %c1_i32_55 : i32 to vector<16x16xi32>
    %83 = arith.subi %76, %82 : vector<16x16xi32>
    %84 = arith.cmpi eq, %75, %83 : vector<16x16xi32>
    %85 = arith.extui %84 : vector<16x16xi1> to vector<16x16xi32>
    %86 = arith.sitofp %85 : vector<16x16xi32> to vector<16x16xf32>
    %cst_56 = arith.constant dense<0.000000e+00> : vector<16x128xf32>
    %87 = tpu.matmul %81, %74, %cst_56 {dimension_numbers = #tpu.dot_dimension_numbers<[1], [0], [0], [1], [0, 0, 1, 1], [], []>} : vector<16x16xf32>, vector<16x128xf32>, vector<16x128xf32> -> vector<16x128xf32>
    %cst_57 = arith.constant dense<0.000000e+00> : vector<16x128xf32>
    %88 = tpu.matmul %86, %74, %cst_57 {dimension_numbers = #tpu.dot_dimension_numbers<[1], [0], [0], [1], [0, 0, 1, 1], [], []>} : vector<16x16xf32>, vector<16x128xf32>, vector<16x128xf32> -> vector<16x128xf32>
    %c0_58 = arith.constant 0 : index
    %c0_59 = arith.constant 0 : index
    %c0_60 = arith.constant 0 : index
    %89 = vector.load %arg4[%c0_58, %c0_59, %c0_60] : memref<3x128x128xf32, #tpu.memory_space<vmem>>, vector<1x128x128xf32>
    %90 = vector.shape_cast %89 : vector<1x128x128xf32> to vector<128x128xf32>
    %cst_61 = arith.constant dense<0.000000e+00> : vector<16x128xf32>
    %91 = tpu.matmul %87, %90, %cst_61 {dimension_numbers = #tpu.dot_dimension_numbers<[1], [0], [0], [1], [0, 0, 1, 1], [], []>} : vector<16x128xf32>, vector<128x128xf32>, vector<16x128xf32> -> vector<16x128xf32>
    %c1_62 = arith.constant 1 : index
    %c0_63 = arith.constant 0 : index
    %c0_64 = arith.constant 0 : index
    %92 = vector.load %arg4[%c1_62, %c0_63, %c0_64] : memref<3x128x128xf32, #tpu.memory_space<vmem>>, vector<1x128x128xf32>
    %93 = vector.shape_cast %92 : vector<1x128x128xf32> to vector<128x128xf32>
    %cst_65 = arith.constant dense<0.000000e+00> : vector<16x128xf32>
    %94 = tpu.matmul %74, %93, %cst_65 {dimension_numbers = #tpu.dot_dimension_numbers<[1], [0], [0], [1], [0, 0, 1, 1], [], []>} : vector<16x128xf32>, vector<128x128xf32>, vector<16x128xf32> -> vector<16x128xf32>
    %95 = arith.addf %91, %94 : vector<16x128xf32>
    %c2_66 = arith.constant 2 : index
    %c0_67 = arith.constant 0 : index
    %c0_68 = arith.constant 0 : index
    %96 = vector.load %arg4[%c2_66, %c0_67, %c0_68] : memref<3x128x128xf32, #tpu.memory_space<vmem>>, vector<1x128x128xf32>
    %97 = vector.shape_cast %96 : vector<1x128x128xf32> to vector<128x128xf32>
    %cst_69 = arith.constant dense<0.000000e+00> : vector<16x128xf32>
    %98 = tpu.matmul %88, %97, %cst_69 {dimension_numbers = #tpu.dot_dimension_numbers<[1], [0], [0], [1], [0, 0, 1, 1], [], []>} : vector<16x128xf32>, vector<128x128xf32>, vector<16x128xf32> -> vector<16x128xf32>
    %99 = arith.addf %95, %98 : vector<16x128xf32>
    %c0_70 = arith.constant 0 : index
    %c0_71 = arith.constant 0 : index
    %100 = vector.load %arg11[%c0_70, %c0_71] : memref<1x128xf32, #tpu.memory_space<vmem>>, vector<1x128xf32>
    %101 = vector.broadcast %100 : vector<1x128xf32> to vector<16x128xf32>
    %102 = arith.addf %99, %101 : vector<16x128xf32>
    %cst_72 = arith.constant 0.000000e+00 : f32
    %103 = vector.broadcast %cst_72 : f32 to vector<16x128xf32>
    %104 = arith.cmpf oge, %102, %103 : vector<16x128xf32>
    %cst_73 = arith.constant 2.000000e-01 : f32
    %105 = vector.broadcast %cst_73 : f32 to vector<16x128xf32>
    %106 = arith.mulf %105, %102 : vector<16x128xf32>
    %107 = arith.select %104, %102, %106 : vector<16x128xi1>, vector<16x128xf32>
    %c0_74 = arith.constant 0 : index
    %c1_75 = arith.constant 1 : index
    %c0_76 = arith.constant 0 : index
    %108 = vector.load %arg1[%c0_74, %c1_75, %c0_76] : memref<1x18x128xf32, #tpu.memory_space<vmem>>, vector<1x16x128xf32>
    %109 = vector.shape_cast %108 : vector<1x16x128xf32> to vector<16x128xf32>
    %c0_77 = arith.constant 0 : index
    %c0_78 = arith.constant 0 : index
    %110 = vector.load %arg6[%c0_77, %c0_78] : memref<128x128xf32, #tpu.memory_space<vmem>>, vector<128x128xf32>
    %cst_79 = arith.constant dense<0.000000e+00> : vector<16x128xf32>
    %111 = tpu.matmul %109, %110, %cst_79 {dimension_numbers = #tpu.dot_dimension_numbers<[1], [0], [0], [1], [0, 0, 1, 1], [], []>} : vector<16x128xf32>, vector<128x128xf32>, vector<16x128xf32> -> vector<16x128xf32>
    %112 = arith.addf %107, %111 : vector<16x128xf32>
    %113 = arith.addf %112, %33 : vector<16x128xf32>
    %c0_80 = arith.constant 0 : index
    %c0_81 = arith.constant 0 : index
    %114 = vector.load %arg12[%c0_80, %c0_81] : memref<1x128xf32, #tpu.memory_space<vmem>>, vector<1x128xf32>
    %115 = vector.broadcast %114 : vector<1x128xf32> to vector<16x128xf32>
    %116 = arith.addf %113, %115 : vector<16x128xf32>
    %c0_82 = arith.constant 0 : index
    %c0_83 = arith.constant 0 : index
    %c0_84 = arith.constant 0 : index
    %117 = vector.load %arg15[%c0_82, %c0_83, %c0_84] : memref<1x16x128xf32, #tpu.memory_space<vmem>>, vector<1x16x128xf32>
    %118 = vector.shape_cast %117 : vector<1x16x128xf32> to vector<16x128xf32>
    %119 = vector.shape_cast %116 : vector<16x128xf32> to vector<1x16x128xf32>
    tpu.vector_store %arg15[%c0_82, %c0_83, %c0_84], %119 {strides = array<i32>} : memref<1x16x128xf32, #tpu.memory_space<vmem>>, vector<1x16x128xf32>,
    %c0_85 = arith.constant 0 : index
    %c0_86 = arith.constant 0 : index
    %c0_87 = arith.constant 0 : index
    %120 = vector.load %arg9[%c0_85, %c0_86, %c0_87] : memref<4x8x16xf32, #tpu.memory_space<vmem>>, vector<1x8x16xf32>
    %121 = vector.shape_cast %120 : vector<1x8x16xf32> to vector<8x16xf32>
    %cst_88 = arith.constant dense<0.000000e+00> : vector<8x128xf32>
    %122 = tpu.matmul %121, %116, %cst_88 {dimension_numbers = #tpu.dot_dimension_numbers<[1], [0], [0], [1], [0, 0, 1, 1], [], []>} : vector<8x16xf32>, vector<16x128xf32>, vector<8x128xf32> -> vector<8x128xf32>
    %c0_89 = arith.constant 0 : index
    %c0_90 = arith.constant 0 : index
    %c0_91 = arith.constant 0 : index
    %123 = vector.load %arg8[%c0_89, %c0_90, %c0_91] : memref<4x128x64xf32, #tpu.memory_space<vmem>>, vector<1x128x64xf32>
    %124 = vector.shape_cast %123 : vector<1x128x64xf32> to vector<128x64xf32>
    %cst_92 = arith.constant dense<0.000000e+00> : vector<8x64xf32>
    %125 = tpu.matmul %122, %124, %cst_92 {dimension_numbers = #tpu.dot_dimension_numbers<[1], [0], [0], [1], [0, 0, 1, 1], [], []>} : vector<8x128xf32>, vector<128x64xf32>, vector<8x64xf32> -> vector<8x64xf32>
    %c1_93 = arith.constant 1 : index
    %c0_94 = arith.constant 0 : index
    %c0_95 = arith.constant 0 : index
    %126 = vector.load %arg9[%c1_93, %c0_94, %c0_95] : memref<4x8x16xf32, #tpu.memory_space<vmem>>, vector<1x8x16xf32>
    %127 = vector.shape_cast %126 : vector<1x8x16xf32> to vector<8x16xf32>
    %cst_96 = arith.constant dense<0.000000e+00> : vector<8x128xf32>
    %128 = tpu.matmul %127, %116, %cst_96 {dimension_numbers = #tpu.dot_dimension_numbers<[1], [0], [0], [1], [0, 0, 1, 1], [], []>} : vector<8x16xf32>, vector<16x128xf32>, vector<8x128xf32> -> vector<8x128xf32>
    %c1_97 = arith.constant 1 : index
    %c0_98 = arith.constant 0 : index
    %c0_99 = arith.constant 0 : index
    %129 = vector.load %arg8[%c1_97, %c0_98, %c0_99] : memref<4x128x64xf32, #tpu.memory_space<vmem>>, vector<1x128x64xf32>
    %130 = vector.shape_cast %129 : vector<1x128x64xf32> to vector<128x64xf32>
    %cst_100 = arith.constant dense<0.000000e+00> : vector<8x64xf32>
    %131 = tpu.matmul %128, %130, %cst_100 {dimension_numbers = #tpu.dot_dimension_numbers<[1], [0], [0], [1], [0, 0, 1, 1], [], []>} : vector<8x128xf32>, vector<128x64xf32>, vector<8x64xf32> -> vector<8x64xf32>
    %132 = arith.addf %125, %131 : vector<8x64xf32>
    %c2_101 = arith.constant 2 : index
    %c0_102 = arith.constant 0 : index
    %c0_103 = arith.constant 0 : index
    %133 = vector.load %arg9[%c2_101, %c0_102, %c0_103] : memref<4x8x16xf32, #tpu.memory_space<vmem>>, vector<1x8x16xf32>
    %134 = vector.shape_cast %133 : vector<1x8x16xf32> to vector<8x16xf32>
    %cst_104 = arith.constant dense<0.000000e+00> : vector<8x128xf32>
    %135 = tpu.matmul %134, %116, %cst_104 {dimension_numbers = #tpu.dot_dimension_numbers<[1], [0], [0], [1], [0, 0, 1, 1], [], []>} : vector<8x16xf32>, vector<16x128xf32>, vector<8x128xf32> -> vector<8x128xf32>
    %c2_105 = arith.constant 2 : index
    %c0_106 = arith.constant 0 : index
    %c0_107 = arith.constant 0 : index
    %136 = vector.load %arg8[%c2_105, %c0_106, %c0_107] : memref<4x128x64xf32, #tpu.memory_space<vmem>>, vector<1x128x64xf32>
    %137 = vector.shape_cast %136 : vector<1x128x64xf32> to vector<128x64xf32>
    %cst_108 = arith.constant dense<0.000000e+00> : vector<8x64xf32>
    %138 = tpu.matmul %135, %137, %cst_108 {dimension_numbers = #tpu.dot_dimension_numbers<[1], [0], [0], [1], [0, 0, 1, 1], [], []>} : vector<8x128xf32>, vector<128x64xf32>, vector<8x64xf32> -> vector<8x64xf32>
    %139 = arith.addf %132, %138 : vector<8x64xf32>
    %c3 = arith.constant 3 : index
    %c0_109 = arith.constant 0 : index
    %c0_110 = arith.constant 0 : index
    %140 = vector.load %arg9[%c3, %c0_109, %c0_110] : memref<4x8x16xf32, #tpu.memory_space<vmem>>, vector<1x8x16xf32>
    %141 = vector.shape_cast %140 : vector<1x8x16xf32> to vector<8x16xf32>
    %cst_111 = arith.constant dense<0.000000e+00> : vector<8x128xf32>
    %142 = tpu.matmul %141, %116, %cst_111 {dimension_numbers = #tpu.dot_dimension_numbers<[1], [0], [0], [1], [0, 0, 1, 1], [], []>} : vector<8x16xf32>, vector<16x128xf32>, vector<8x128xf32> -> vector<8x128xf32>
    %c3_112 = arith.constant 3 : index
    %c0_113 = arith.constant 0 : index
    %c0_114 = arith.constant 0 : index
    %143 = vector.load %arg8[%c3_112, %c0_113, %c0_114] : memref<4x128x64xf32, #tpu.memory_space<vmem>>, vector<1x128x64xf32>
    %144 = vector.shape_cast %143 : vector<1x128x64xf32> to vector<128x64xf32>
    %cst_115 = arith.constant dense<0.000000e+00> : vector<8x64xf32>
    %145 = tpu.matmul %142, %144, %cst_115 {dimension_numbers = #tpu.dot_dimension_numbers<[1], [0], [0], [1], [0, 0, 1, 1], [], []>} : vector<8x128xf32>, vector<128x64xf32>, vector<8x64xf32> -> vector<8x64xf32>
    %146 = arith.addf %139, %145 : vector<8x64xf32>
    %c0_116 = arith.constant 0 : index
    %c0_117 = arith.constant 0 : index
    %c0_118 = arith.constant 0 : index
    %147 = vector.load %arg16[%c0_116, %c0_117, %c0_118] : memref<1x8x64xf32, #tpu.memory_space<vmem>>, vector<1x8x64xf32>
    %148 = vector.shape_cast %147 : vector<1x8x64xf32> to vector<8x64xf32>
    %149 = vector.shape_cast %146 : vector<8x64xf32> to vector<1x8x64xf32>
    tpu.vector_store %arg16[%c0_116, %c0_117, %c0_118], %149 {strides = array<i32>} : memref<1x8x64xf32, #tpu.memory_space<vmem>>, vector<1x8x64xf32>,
    return
  }
  func.func @transform_0(%arg0: i32) -> (i32, i32, i32) {
    %c0_i32 = arith.constant 0 : i32
    %c0_i32_0 = arith.constant 0 : i32
    %c0_i32_1 = arith.constant 0 : i32
    return %arg0, %c0_i32, %c0_i32_0 : i32, i32, i32
  }
  func.func @transform_1(%arg0: i32) -> (i32, i32, i32) {
    %c0_i32 = arith.constant 0 : i32
    %c0_i32_0 = arith.constant 0 : i32
    %c0_i32_1 = arith.constant 0 : i32
    return %arg0, %c0_i32, %c0_i32_0 : i32, i32, i32
  }
  func.func @transform_2(%arg0: i32) -> (i32, i32, i32) {
    %c0_i32 = arith.constant 0 : i32
    %c0_i32_0 = arith.constant 0 : i32
    %c0_i32_1 = arith.constant 0 : i32
    %c0_i32_2 = arith.constant 0 : i32
    return %c0_i32, %c0_i32_0, %c0_i32_1 : i32, i32, i32
  }
  func.func @transform_3(%arg0: i32) -> (i32, i32, i32) {
    %c0_i32 = arith.constant 0 : i32
    %c0_i32_0 = arith.constant 0 : i32
    %c0_i32_1 = arith.constant 0 : i32
    %c0_i32_2 = arith.constant 0 : i32
    return %c0_i32, %c0_i32_0, %c0_i32_1 : i32, i32, i32
  }
  func.func @transform_4(%arg0: i32) -> (i32, i32, i32) {
    %c0_i32 = arith.constant 0 : i32
    %c0_i32_0 = arith.constant 0 : i32
    %c0_i32_1 = arith.constant 0 : i32
    %c0_i32_2 = arith.constant 0 : i32
    return %c0_i32, %c0_i32_0, %c0_i32_1 : i32, i32, i32
  }
  func.func @transform_5(%arg0: i32) -> (i32, i32) {
    %c0_i32 = arith.constant 0 : i32
    %c0_i32_0 = arith.constant 0 : i32
    %c0_i32_1 = arith.constant 0 : i32
    return %c0_i32, %c0_i32_0 : i32, i32
  }
  func.func @transform_6(%arg0: i32) -> (i32, i32) {
    %c0_i32 = arith.constant 0 : i32
    %c0_i32_0 = arith.constant 0 : i32
    %c0_i32_1 = arith.constant 0 : i32
    return %c0_i32, %c0_i32_0 : i32, i32
  }
  func.func @transform_7(%arg0: i32) -> (i32, i32, i32) {
    %c0_i32 = arith.constant 0 : i32
    %c0_i32_0 = arith.constant 0 : i32
    %c0_i32_1 = arith.constant 0 : i32
    %c0_i32_2 = arith.constant 0 : i32
    return %c0_i32, %c0_i32_0, %c0_i32_1 : i32, i32, i32
  }
  func.func @transform_8(%arg0: i32) -> (i32, i32, i32) {
    %c0_i32 = arith.constant 0 : i32
    %c0_i32_0 = arith.constant 0 : i32
    %c0_i32_1 = arith.constant 0 : i32
    %c0_i32_2 = arith.constant 0 : i32
    return %c0_i32, %c0_i32_0, %c0_i32_1 : i32, i32, i32
  }
  func.func @transform_9(%arg0: i32) -> (i32, i32) {
    %c0_i32 = arith.constant 0 : i32
    %c0_i32_0 = arith.constant 0 : i32
    %c0_i32_1 = arith.constant 0 : i32
    return %c0_i32, %c0_i32_0 : i32, i32
  }
  func.func @transform_10(%arg0: i32) -> (i32, i32) {
    %c0_i32 = arith.constant 0 : i32
    %c0_i32_0 = arith.constant 0 : i32
    %c0_i32_1 = arith.constant 0 : i32
    return %c0_i32, %c0_i32_0 : i32, i32
  }
  func.func @transform_11(%arg0: i32) -> (i32, i32) {
    %c0_i32 = arith.constant 0 : i32
    %c0_i32_0 = arith.constant 0 : i32
    %c0_i32_1 = arith.constant 0 : i32
    return %c0_i32, %c0_i32_0 : i32, i32
  }
  func.func @transform_12(%arg0: i32) -> (i32, i32) {
    %c0_i32 = arith.constant 0 : i32
    %c0_i32_0 = arith.constant 0 : i32
    %c0_i32_1 = arith.constant 0 : i32
    return %c0_i32, %c0_i32_0 : i32, i32
  }
  func.func @transform_13(%arg0: i32) -> (i32, i32) {
    %c0_i32 = arith.constant 0 : i32
    %c0_i32_0 = arith.constant 0 : i32
    %c0_i32_1 = arith.constant 0 : i32
    return %c0_i32, %c0_i32_0 : i32, i32
  }
  func.func @transform_14(%arg0: i32) -> (i32, i32, i32) {
    %c0_i32 = arith.constant 0 : i32
    %c0_i32_0 = arith.constant 0 : i32
    %c0_i32_1 = arith.constant 0 : i32
    return %arg0, %c0_i32, %c0_i32_0 : i32, i32, i32
  }
  func.func @transform_15(%arg0: i32) -> (i32, i32, i32) {
    %c0_i32 = arith.constant 0 : i32
    %c0_i32_0 = arith.constant 0 : i32
    %c0_i32_1 = arith.constant 0 : i32
    return %arg0, %c0_i32, %c0_i32_0 : i32, i32, i32
  }
}

</mosaic_0001>

<bundles_post_ra>
// kernel: tile.38
= control target key start
LH: loop header
LB: loop body
LE: loop exit
PB: predicated region body
PF: predicated region fallthrough
CT: control target
= control target key end

     0   :  { %s28_s0 = inlined_call_operand.vmem [shape: f32[8], index: 0, kind: input, shape index: {}]   ;;  %s29_s1 = inlined_call_operand.vmem [shape: f32[16,8], index: 1, kind: output, shape index: {}]  }
   0x1   :  { %v4_v0 = vld [vmem:[%s28_s0] ss:$0 sm:$0xff] }
   0x2   :  { %5 = vst [vmem:[%s29_s1] sm:$0xff] %v4_v0  ;;  %8 = vst [vmem:[%s29_s1 + $0x8] sm:$0xff] %v4_v0 }

// kernel: tile.39
= control target key start
LH: loop header
LB: loop body
LE: loop exit
PB: predicated region body
PF: predicated region fallthrough
CT: control target
= control target key end

     0   :  { %s131_s10 = smov 120   ;;  %s132_s11 = smov 104   ;;  %vm3_vm0 = vcmask 64512   ;;  %vm9_vm1 = vcmask 1048512   ;;  %vm15_vm2 = vcmask 982912   ;;  %vm21_vm3 = vcmask 917312   ;;  %s207_s0 = inlined_call_operand.vmem [shape: f32[16,8], index: 0, kind: input, shape index: {}]   ;;  %s208_s1 = inlined_call_operand.vmem [shape: f32[1,128], index: 1, kind: output, shape index: {}]  }
   0x1   :  { %v101_v0 = vld [vmem:[%s207_s0 + $0xf] sm:$0x1]   ;;  %v103_v1 = vld [vmem:[%s207_s0 + $0xd] sm:$0x1]   ;;  %v102_v2 = vld [vmem:[%s207_s0 + $0xe] sm:$0x1]  }
   0x2   :  { %7 = vrot.lane.b32.xlu0 %v101_v0, %s131_s10  ;;  %19 = vrot.lane.b32.xlu1 %v103_v1, %s132_s11  ;;  %v104_v3 = vld [vmem:[%s207_s0 + $0xc] sm:$0x1]   ;;  %s133_s16 = smov 112   ;;  %s134_s17 = smov 96   ;;  %v105_v4 = vld [vmem:[%s207_s0 + $0xb] sm:$0x1]  }
   0x3   :  { %v106_v5 = vld [vmem:[%s207_s0 + $0xa] sm:$0x1]   ;;  %v2_v6 = vld [vmem:[%s207_s0] sm:$0x1]   ;;  %s135_s24 = smov 88   ;;  %s136_s25 = smov 80  }
   0x4   :  { %4 = vst.msk [vmem:[#allocation0] sm:$0x1] %vm3_vm0, %v2_v6   ;;  %v107_v7 = vld [vmem:[%s207_s0 + $0x9] sm:$0x1]   ;;  %v108_v8 = vld [vmem:[%s207_s0 + $0x8] sm:$0x1]  }
   0x5   :  { %s137_s30 = smov 72   ;;  %s138_s2 = smov 64   ;;  %v109_v9 = vld [vmem:[%s207_s0 + $0x7] sm:$0x1]   ;;  %v110_v10 = vld [vmem:[%s207_s0 + $0x6] sm:$0x1]  }
   0x6   :  { %13 = vrot.lane.b32.xlu0 %v102_v2, %s133_s16  ;;  %25 = vrot.lane.b32.xlu1 %v104_v3, %s134_s17  ;;  %s139_s7 = smov 56   ;;  %s140_s8 = smov 48   ;;  %v111_v11 = vld [vmem:[%s207_s0 + $0x5] sm:$0x1]   ;;  %v112_v12 = vld [vmem:[%s207_s0 + $0x4] sm:$0x1]  }
   0x7   :  { %s141_s13 = smov 40   ;;  %s142_s14 = smov 32   ;;  %v113_v13 = vld [vmem:[%s207_s0 + $0x3] sm:$0x1]   ;;  %v114_v14 = vld [vmem:[%s207_s0 + $0x2] sm:$0x1]  }
   0x8   :  { %s143_s19 = smov 24   ;;  %s144_s20 = smov 16   ;;  %v115_v15 = vld [vmem:[%s207_s0 + $0x1] sm:$0x1]   ;;  %vm27_vm4 = vcmask 851712   ;;  %vm33_vm5 = vcmask 786112  }
   0x9   :  { %s145_s0 = smov 8   ;;  %vm39_vm6 = vcmask 720512   ;;  %vm45_vm7 = vcmask 654912   ;;  %vm51_vm8 = vcmask 589312   ;;  %vm57_vm9 = vcmask 523712  }
   0xa   :  { %31 = vrot.lane.b32.xlu0 %v105_v4, %s135_s24  ;;  %37 = vrot.lane.b32.xlu1 %v106_v5, %s136_s25  ;;  %vm63_vm10 = vcmask 458112   ;;  %vm69_vm11 = vcmask 392512   ;;  %vm75_vm12 = vcmask 326912   ;;  %vm81_vm13 = vcmask 261312  }
   0xb   :  { %vm87_vm14 = vcmask 195712   ;;  %vm93_vm15 = vcmask 130112  }
   0xe   :  { %43 = vrot.lane.b32.xlu0 %v107_v7, %s137_s30  ;;  %49 = vrot.lane.b32.xlu1 %v108_v8, %s138_s2 }
  0x12   :  { %55 = vrot.lane.b32.xlu0 %v109_v9, %s139_s7  ;;  %61 = vrot.lane.b32.xlu1 %v110_v10, %s140_s8 }
  0x16   :  { %67 = vrot.lane.b32.xlu0 %v111_v11, %s141_s13  ;;  %73 = vrot.lane.b32.xlu1 %v112_v12, %s142_s14 }
  0x1a   :  { %79 = vrot.lane.b32.xlu0 %v113_v13, %s143_s19  ;;  %85 = vrot.lane.b32.xlu1 %v114_v14, %s144_s20 }
  0x1e   :  { %91 = vrot.lane.b32.xlu0 %v115_v15, %s145_s0 }
  0x74   :  { %v8_v16 = vpop.permute.xlu0 %7   ;;  %v20_v17 = vpop.permute.xlu1 %19  }
  0x75   :  { %10 = vst.msk [vmem:[#allocation0] sm:$0x1] %vm9_vm1, %v8_v16  }
  0x78   :  { %v14_v18 = vpop.permute.xlu0 %13   ;;  %v26_v19 = vpop.permute.xlu1 %25  }
  0x79   :  { %16 = vst.msk [vmem:[#allocation0] sm:$0x1] %vm15_vm2, %v14_v18  }
  0x7a   :  { %22 = vst.msk [vmem:[#allocation0] sm:$0x1] %vm21_vm3, %v20_v17  }
  0x7b   :  { %28 = vst.msk [vmem:[#allocation0] sm:$0x1] %vm27_vm4, %v26_v19  }
  0x7c   :  { %v32_v20 = vpop.permute.xlu0 %31   ;;  %v38_v21 = vpop.permute.xlu1 %37  }
  0x7d   :  { %34 = vst.msk [vmem:[#allocation0] sm:$0x1] %vm33_vm5, %v32_v20  }
  0x7e   :  { %40 = vst.msk [vmem:[#allocation0] sm:$0x1] %vm39_vm6, %v38_v21  }
  0x80   :  { %v44_v22 = vpop.permute.xlu0 %43   ;;  %v50_v23 = vpop.permute.xlu1 %49  }
  0x81   :  { %46 = vst.msk [vmem:[#allocation0] sm:$0x1] %vm45_vm7, %v44_v22  }
  0x82   :  { %52 = vst.msk [vmem:[#allocation0] sm:$0x1] %vm51_vm8, %v50_v23  }
  0x84   :  { %v56_v24 = vpop.permute.xlu0 %55   ;;  %v62_v25 = vpop.permute.xlu1 %61  }
  0x85   :  { %58 = vst.msk [vmem:[#allocation0] sm:$0x1] %vm57_vm9, %v56_v24  }
  0x86   :  { %64 = vst.msk [vmem:[#allocation0] sm:$0x1] %vm63_vm10, %v62_v25  }
  0x88   :  { %v68_v26 = vpop.permute.xlu0 %67   ;;  %v74_v27 = vpop.permute.xlu1 %73  }
  0x89   :  { %70 = vst.msk [vmem:[#allocation0] sm:$0x1] %vm69_vm11, %v68_v26  }
  0x8a   :  { %76 = vst.msk [vmem:[#allocation0] sm:$0x1] %vm75_vm12, %v74_v27  }
  0x8c   :  { %v80_v28 = vpop.permute.xlu0 %79   ;;  %v86_v29 = vpop.permute.xlu1 %85  }
  0x8d   :  { %82 = vst.msk [vmem:[#allocation0] sm:$0x1] %vm81_vm13, %v80_v28  }
  0x8e   :  { %88 = vst.msk [vmem:[#allocation0] sm:$0x1] %vm87_vm14, %v86_v29  }
  0x90   :  { %v92_v30 = vpop.permute.xlu0 %91  }
  0x91   :  { %94 = vst.msk [vmem:[#allocation0] sm:$0x1] %vm93_vm15, %v92_v30  }
  0x98   :  { %v98_v31 = vld [vmem:[#allocation0] sm:$0x1] }
  0x99   :  { %100 = vst [vmem:[%s208_s1] sm:$0x1] %v98_v31 }

// kernel: unet_conv_block.1
= control target key start
LH: loop header
LB: loop body
LE: loop exit
PB: predicated region body
PF: predicated region fallthrough
CT: control target
= control target key end

     0   :  { %s4418_s18 = smov 0   ;;  %s5484_s0 = inlined_call_operand.vmem [shape: f32[2,18,128], index: 0, kind: input, shape index: {}]   ;;  %s5485_s1 = inlined_call_operand.vmem [shape: f32[2,18,256], index: 1, kind: input, shape index: {}]   ;;  %s5486_s2 = inlined_call_operand.vmem [shape: f32[3,128,128], index: 2, kind: input, shape index: {}]   ;;  %s5487_s3 = inlined_call_operand.vmem [shape: f32[3,128,128], index: 3, kind: input, shape index: {}]   ;;  %s5488_s4 = inlined_call_operand.vmem [shape: f32[3,256,128], index: 4, kind: input, shape index: {}]   ;;  %s5489_s5 = inlined_call_operand.vmem [shape: f32[128,128], index: 5, kind: input, shape index: {}]   ;;  %s5490_s6 = inlined_call_operand.vmem [shape: f32[128,128], index: 6, kind: input, shape index: {}]   ;;  %s5491_s7 = inlined_call_operand.vmem [shape: f32[4,128,64], index: 7, kind: input, shape index: {}]   ;;  %s5492_s8 = inlined_call_operand.vmem [shape: f32[4,8,16], index: 8, kind: input, shape index: {}]   ;;  %s5493_s9 = inlined_call_operand.vmem [shape: f32[1,128], index: 9, kind: input, shape index: {}]   ;;  %s5494_s10 = inlined_call_operand.vmem [shape: f32[1,128], index: 10, kind: input, shape index: {}]   ;;  %s5495_s11 = inlined_call_operand.vmem [shape: f32[1,128], index: 11, kind: input, shape index: {}]   ;;  %s5496_s12 = inlined_call_operand.vmem [shape: f32[1,128], index: 12, kind: input, shape index: {}]   ;;  %s5497_s13 = inlined_call_operand.vmem [shape: f32[1,128], index: 13, kind: input, shape index: {}]   ;;  %s5498_s14 = inlined_call_operand.vmem [shape: f32[2,16,128], index: 14, kind: output, shape index: {0}]   ;;  %s5499_s15 = inlined_call_operand.vmem [shape: f32[2,8,64], index: 15, kind: output, shape index: {1}]  }
   0x1 LB: > { %s2743_s19 = sadd.s32 4294967295, %s4333_s18   ;;  %p2747_p0 = scmp.ge.s32.totalorder %s4333_s18, 1  ;;  %s4333_s18 = sphi %s4418_s18, %s26_s18  }
   0x2   : > { %p450_p1 = scmp.lt.s32.totalorder %s4333_s18, 3 }
   0x4   : > { %p451_p2 = pnand %p2747_p0, %p450_p1 }
   0x5   : > { %v2753_v0 = vld [vmem:[%s5486_s2 + $0x80] sm:$0xff] (!%p451_p2)  ;;  %v2754_v1 = vld [vmem:[%s5486_s2 + $0x88] sm:$0xff] (!%p451_p2)  ;;  %v2755_v2 = vld [vmem:[%s5486_s2 + $0x90] sm:$0xff] (!%p451_p2)  ;;  %p507_p3 = scmp.lt.s32.totalorder (!%p451_p2), %s2743_s19, 1  ;;  %vm1096_vm0 = vcmask (!%p451_p2), 1045504   ;;  %vm794_vm1 = vcmask (!%p451_p2), 1046528  }
   0x6   : > { %454 = sbr.rel (%p451_p2) target bundleno = 1844 (0x734), region = 76  ;;  %v3812_v3 = vpack.c.bf16 (!%p451_p2), %v2754_v1, %v2753_v0  ;;  %v2756_v4 = vld [vmem:[%s5486_s2 + $0x98] sm:$0xff] (!%p451_p2)  ;;  %v2757_v6 = vld [vmem:[%s5486_s2 + $0xa0] sm:$0xff] (!%p451_p2)  ;;  %v2758_v7 = vld [vmem:[%s5486_s2 + $0xa8] sm:$0xff] (!%p451_p2)  ;;  %vm4336_vm2 = vmmov (!%p451_p2), 0   ;;  %vm1434_vm4 = vcmask (!%p451_p2), 130048  }
   0x7   : > { %v3816_v5 = vpack.c.bf16 (!%p451_p2), %v2756_v4, %v2755_v2  ;;  %v3820_v8 = vpack.c.bf16 (!%p451_p2), %v2758_v7, %v2757_v6  ;;  %v2759_v9 = vld [vmem:[%s5486_s2 + $0xb0] sm:$0xff] (!%p451_p2)  ;;  %v2760_v10 = vld [vmem:[%s5486_s2 + $0xb8] sm:$0xff] (!%p451_p2)  ;;  %v564_v11 = vld [vmem:[%s5488_s4 + $0x80] sm:$0xff] (!%p451_p2)  ;;  %vm2643_vm13 = vcmask (!%p451_p2), 523264  }
   0x8   : > { %3813 = vmatprep.subr.bf16.mxu0 (!%p451_p2), %v3812_v3  ;;  %v565_v12 = vld [vmem:[%s5488_s4 + $0x88] sm:$0xff] (!%p451_p2)  ;;  %v548_v13 = vld [vmem:[%s5488_s4] sm:$0xff] (!%p451_p2)  ;;  %v566_v18 = vld [vmem:[%s5488_s4 + $0x90] sm:$0xff] (!%p451_p2)  ;;  %v3824_v19 = vpack.c.bf16 (!%p451_p2), %v2760_v10, %v2759_v9 }
   0x9   : > { %3815 = vmatpush3.bf16.msra.mxu0 (!%p451_p2), %v3812_v3  ;;  %v3908_v15 = vpack.c.bf16 (!%p451_p2), %v565_v12, %v564_v11  ;;  %v549_v16 = vld [vmem:[%s5488_s4 + $0x8] sm:$0xff] (!%p451_p2)  ;;  %v567_v20 = vld [vmem:[%s5488_s4 + $0x98] sm:$0xff] (!%p451_p2)  ;;  %v550_v21 = vld [vmem:[%s5488_s4 + $0x10] sm:$0xff] (!%p451_p2) }
   0xa   : > { %3817 = vmatprep.subr.bf16.mxu0 (!%p451_p2), %v3816_v5  ;;  %v3910_v17 = vpack.c.bf16 (!%p451_p2), %v549_v16, %v548_v13  ;;  %v551_v22 = vld [vmem:[%s5488_s4 + $0x18] sm:$0xff] (!%p451_p2)  ;;  %v2761_v23 = vld [vmem:[%s5486_s2 + $0xc0] sm:$0xff] (!%p451_p2)  ;;  %v2762_v24 = vld [vmem:[%s5486_s2 + $0xc8] sm:$0xff] (!%p451_p2)  ;;  %v3912_v25 = vpack.c.bf16 (!%p451_p2), %v567_v20, %v566_v18 }
   0xb   : > { %3909 = vmatprep.subr.bf16.mxu1 (!%p451_p2), %v3908_v15  ;;  %v3914_v26 = vpack.c.bf16 (!%p451_p2), %v551_v22, %v550_v21  ;;  %v568_v27 = vld [vmem:[%s5488_s4 + $0xa0] sm:$0xff] (!%p451_p2)  ;;  %v569_v28 = vld [vmem:[%s5488_s4 + $0xa8] sm:$0xff] (!%p451_p2)  ;;  %v570_v32 = vld [vmem:[%s5488_s4 + $0xb0] sm:$0xff] (!%p451_p2)  ;;  %v3828_v33 = vpack.c.bf16 (!%p451_p2), %v2762_v24, %v2761_v23 }
   0xc   : > { %3911 = vmatpush3.bf16.msra.mxu1 (!%p451_p2), %v3910_v17  ;;  %v552_v29 = vld [vmem:[%s5488_s4 + $0x20] sm:$0xff] (!%p451_p2)  ;;  %v553_v30 = vld [vmem:[%s5488_s4 + $0x28] sm:$0xff] (!%p451_p2)  ;;  %v3916_v31 = vpack.c.bf16 (!%p451_p2), %v569_v28, %v568_v27  ;;  %v571_v34 = vld [vmem:[%s5488_s4 + $0xb8] sm:$0xff] (!%p451_p2) }
   0xd   : > { %s5501_s19 = smov (!%p507_p3, %s2743_s19), 1  ;;  %3819 = vmatpush3.bf16.msra.mxu0 %v3816_v5  ;;  %3913 = vmatprep.subr.bf16.mxu1 %v3912_v25  ;;  %v2763_v35 = vld [vmem:[%s5486_s2 + $0xd0] sm:$0xff]  ;;  %v2764_v36 = vld [vmem:[%s5486_s2 + $0xd8] sm:$0xff]  ;;  %v3918_v37 = vpack.c.bf16 %v553_v30, %v552_v29  ;;  %v3920_v38 = vpack.c.bf16 %v571_v34, %v570_v32  ;;  %v572_v41 = vld [vmem:[%s5488_s4 + $0xc0] sm:$0xff] }
   0xe   : > { %s4310_s17 = smul.u32 24, %s5501_s19  ;;  %3821 = vmatprep.subr.bf16.mxu0 %v3820_v8  ;;  %v554_v39 = vld [vmem:[%s5488_s4 + $0x30] sm:$0xff]  ;;  %v555_v40 = vld [vmem:[%s5488_s4 + $0x38] sm:$0xff]  ;;  %v573_v42 = vld [vmem:[%s5488_s4 + $0xc8] sm:$0xff]  ;;  %v3832_v43 = vpack.c.bf16 %v2764_v36, %v2763_v35  ;;  %s2952_s16 = sshll.u32 %s5501_s19, 4 }
   0xf   : > { %v2765_v44 = vld [vmem:[%s5486_s2 + $0xe0] sm:$0xff]  ;;  %v2766_v45 = vld [vmem:[%s5486_s2 + $0xe8] sm:$0xff]  ;;  %v3922_v46 = vpack.c.bf16 %v555_v40, %v554_v39  ;;  %v3924_v47 = vpack.c.bf16 %v573_v42, %v572_v41  ;;  %v574_v50 = vld [vmem:[%s5488_s4 + $0xd0] sm:$0xff]  ;;  %s521_s22 = scalar_lea.vmem %s5498_s14, %s2952_s16  ;;  %s2752_s30 = sshll.u32 %s5501_s19, 3 }
  0x10   : > { %s4456_s26 = scalar_lea.vmem %s5484_s0, %s4310_s17  ;;  %3915 = vmatpush3.bf16.msra.mxu1 %v3914_v26  ;;  %s4311_s17 = smul.u32 48, %s5501_s19  ;;  %v556_v48 = vld [vmem:[%s5488_s4 + $0x40] sm:$0xff]  ;;  %v557_v49 = vld [vmem:[%s5488_s4 + $0x48] sm:$0xff]  ;;  %v575_v51 = vld [vmem:[%s5488_s4 + $0xd8] sm:$0xff]  ;;  %v3836_v52 = vpack.c.bf16 %v2766_v45, %v2765_v44 }
  0x11   : > { %v580_v14 = vld [vmem:[%s4456_s26 + $0x1] sm:$0xff]  ;;  %3823 = vmatpush3.bf16.msra.mxu0 %v3820_v8  ;;  %3917 = vmatprep.subr.bf16.mxu1 %v3916_v31  ;;  %v2767_v53 = vld [vmem:[%s5486_s2 + $0xf0] sm:$0xff]  ;;  %v2768_v54 = vld [vmem:[%s5486_s2 + $0xf8] sm:$0xff]  ;;  %v3926_v55 = vpack.c.bf16 %v557_v49, %v556_v48  ;;  %v3928_v56 = vpack.c.bf16 %v575_v51, %v574_v50  ;;  %s525_s20 = scalar_lea.vmem %s5499_s15, %s2752_s30 }
  0x12   : > { %3347 = vmatprep.mubr.f32.mxu0 %v580_v14  ;;  %3825 = vmatprep.subr.bf16.mxu0 %v3824_v19  ;;  %s4547_s27 = scalar_lea.vmem %s5485_s1, %s4311_s17  ;;  %v558_v57 = vld [vmem:[%s5488_s4 + $0x50] sm:$0xff]  ;;  %v559_v58 = vld [vmem:[%s5488_s4 + $0x58] sm:$0xff]  ;;  %v576_v59 = vld [vmem:[%s5488_s4 + $0xe0] sm:$0xff]  ;;  %v3840_v62 = vpack.c.bf16 %v2768_v54, %v2767_v53 }
  0x13   : > { %v577_v60 = vld [vmem:[%s5488_s4 + $0xe8] sm:$0xff]  ;;  %v528_v63 = vld [vmem:[%s5486_s2] sm:$0xff]  ;;  %v3930_v1 = vpack.c.bf16 %v559_v58, %v558_v57  ;;  %v578_v5 = vld [vmem:[%s5488_s4 + $0xf0] sm:$0xff] }
  0x14   : > { %3919 = vmatpush3.bf16.msra.mxu1 %v3918_v37  ;;  %v545_v61 = vld [vmem:[%s4547_s27 + $0x8] sm:$0xff]  ;;  %v3932_v2 = vpack.c.bf16 %v577_v60, %v576_v59  ;;  %v560_v3 = vld [vmem:[%s5488_s4 + $0x60] sm:$0xff]  ;;  %v579_v6 = vld [vmem:[%s5488_s4 + $0xf8] sm:$0xff] }
  0x15   : > { %3827 = vmatpush3.bf16.msra.mxu0 %v3824_v19  ;;  %3921 = vmatprep.subr.bf16.mxu1 %v3920_v38  ;;  %v529_v0 = vld [vmem:[%s5486_s2 + $0x8] sm:$0xff]  ;;  %v530_v8 = vld [vmem:[%s5486_s2 + $0x10] sm:$0xff]  ;;  %v531_v9 = vld [vmem:[%s5486_s2 + $0x18] sm:$0xff]  ;;  %v3936_v11 = vpack.c.bf16 %v579_v6, %v578_v5 }
  0x16   : > { %3829 = vmatprep.subr.bf16.mxu0 %v3828_v33  ;;  %948 = vmatprep.mubr.f32.mxu1 %v545_v61  ;;  %v561_v4 = vld [vmem:[%s5488_s4 + $0x68] sm:$0xff]  ;;  %v3844_v7 = vpack.c.bf16 %v529_v0, %v528_v63  ;;  %v562_v12 = vld [vmem:[%s5488_s4 + $0x70] sm:$0xff]  ;;  %v563_v13 = vld [vmem:[%s5488_s4 + $0x78] sm:$0xff]  ;;  %v3848_v17 = vpack.c.bf16 %v531_v9, %v530_v8 }
  0x17   : > { %v3934_v10 = vpack.c.bf16 %v561_v4, %v560_v3  ;;  %v581_v14 = vld [vmem:[%s4456_s26 + $0x9] sm:$0xff]  ;;  %v2833_v15 = vld [vmem:[%s5488_s4 + $0x280] sm:$0xff]  ;;  %v3938_v21 = vpack.c.bf16 %v563_v13, %v562_v12  ;;  %v2836_v26 = vld [vmem:[%s5488_s4 + $0x298] sm:$0xff] }
  0x18   : > { %3923 = vmatpush3.bf16.msra.mxu1 %v3922_v46  ;;  %v2834_v16 = vld [vmem:[%s5488_s4 + $0x288] sm:$0xff]  ;;  %v526_v18 = vld [vmem:[%s4456_s26] sm:$0xff]  ;;  %v2835_v25 = vld [vmem:[%s5488_s4 + $0x290] sm:$0xff] }
  0x19   : > { %3831 = vmatpush3.bf16.msra.mxu0 %v3828_v33  ;;  %3925 = vmatprep.subr.bf16.mxu1 %v3924_v47  ;;  %v532_v19 = vld [vmem:[%s5486_s2 + $0x20] sm:$0xff]  ;;  %v533_v20 = vld [vmem:[%s5486_s2 + $0x28] sm:$0xff]  ;;  %v3972_v22 = vpack.c.bf16 %v2834_v16, %v2833_v15  ;;  %v534_v28 = vld [vmem:[%s5486_s2 + $0x30] sm:$0xff]  ;;  %v3976_v32 = vpack.c.bf16 %v2836_v26, %v2835_v25 }
  0x1a   : > { %3833 = vmatprep.subr.bf16.mxu0 %v3832_v43  ;;  %v2817_v23 = vld [vmem:[%s5488_s4 + $0x200] sm:$0xff]  ;;  %v2818_v24 = vld [vmem:[%s5488_s4 + $0x208] sm:$0xff]  ;;  %v3852_v27 = vpack.c.bf16 %v533_v20, %v532_v19  ;;  %v535_v29 = vld [vmem:[%s5486_s2 + $0x38] sm:$0xff] }
  0x1b   : > { %v544_v30 = vld [vmem:[%s4547_s27] sm:$0xff]  ;;  %v3974_v31 = vpack.c.bf16 %v2818_v24, %v2817_v23  ;;  %v2819_v33 = vld [vmem:[%s5488_s4 + $0x210] sm:$0xff]  ;;  %v2820_v34 = vld [vmem:[%s5488_s4 + $0x218] sm:$0xff]  ;;  %v3856_v37 = vpack.c.bf16 %v535_v29, %v534_v28 }
  0x1c   : > { %3927 = vmatpush3.bf16.msra.mxu1 %v3926_v55  ;;  %v2837_v35 = vld [vmem:[%s5488_s4 + $0x2a0] sm:$0xff]  ;;  %v2838_v36 = vld [vmem:[%s5488_s4 + $0x2a8] sm:$0xff]  ;;  %v3978_v40 = vpack.c.bf16 %v2820_v34, %v2819_v33  ;;  %v4656_v44 = vld [vmem:[%s4547_s27 + $0x18] sm:$0xff] }
  0x1d   : > { %3835 = vmatpush3.bf16.msra.mxu0 %v3832_v43  ;;  %3929 = vmatprep.subr.bf16.mxu1 %v3928_v56  ;;  %v536_v38 = vld [vmem:[%s5486_s2 + $0x40] sm:$0xff]  ;;  %v537_v39 = vld [vmem:[%s5486_s2 + $0x48] sm:$0xff]  ;;  %v3980_v42 = vpack.c.bf16 %v2838_v36, %v2837_v35  ;;  %v4659_v45 = vld [vmem:[%s4547_s27 + $0x10] sm:$0xff]  ;;  %v1101_v53 = vrot.slane %v4656_v44, 2  ;;  %v799_v29 = vrot.slane %v4656_v44, 1 }
  0x1e   : > { %3837 = vmatprep.subr.bf16.mxu0 %v3836_v52  ;;  %v2821_v41 = vld [vmem:[%s5488_s4 + $0x220] sm:$0xff]  ;;  %v2822_v43 = vld [vmem:[%s5488_s4 + $0x228] sm:$0xff]  ;;  %v2839_v46 = vld [vmem:[%s5488_s4 + $0x2b0] sm:$0xff]  ;;  %v3860_v48 = vpack.c.bf16 %v537_v39, %v536_v38 }
  0x1f   : > { %v2840_v47 = vld [vmem:[%s5488_s4 + $0x2b8] sm:$0xff]  ;;  %v538_v49 = vld [vmem:[%s5486_s2 + $0x50] sm:$0xff]  ;;  %v3982_v51 = vpack.c.bf16 %v2822_v43, %v2821_v41  ;;  %v2841_v58 = vld [vmem:[%s5488_s4 + $0x2c0] sm:$0xff] }
  0x20   : > { %3931 = vmatpush3.bf16.msra.mxu1 %v3930_v1  ;;  %v539_v50 = vld [vmem:[%s5486_s2 + $0x58] sm:$0xff]  ;;  %v3984_v54 = vpack.c.bf16 %v2840_v47, %v2839_v46  ;;  %v2823_v55 = vld [vmem:[%s5488_s4 + $0x230] sm:$0xff]  ;;  %v2842_v59 = vld [vmem:[%s5488_s4 + $0x2c8] sm:$0xff] }
  0x21   : > { %3839 = vmatpush3.bf16.msra.mxu0 %v3836_v52  ;;  %3933 = vmatprep.subr.bf16.mxu1 %v3932_v2  ;;  %v1056_v52 = vld [vmem:[%s4547_s27 + $0x8] sm:$0xfc]  ;;  %v2824_v56 = vld [vmem:[%s5488_s4 + $0x238] sm:$0xff]  ;;  %v3864_v60 = vpack.c.bf16 %v539_v50, %v538_v49  ;;  %v3988_v1 = vpack.c.bf16 %v2842_v59, %v2841_v58  ;;  %v2825_v2 = vld [vmem:[%s5488_s4 + $0x240] sm:$0xff]  ;;  %v1098_v49 = vrot.slane %v4659_v45, 2 }
  0x22   : > { %3841 = vmatprep.subr.bf16.mxu0 %v3840_v62  ;;  %v1100_v57 = vrot.slane %v1056_v52, 2  ;;  %v541_v63 = vld [vmem:[%s5486_s2 + $0x68] sm:$0xff]  ;;  %v3986_v0 = vpack.c.bf16 %v2824_v56, %v2823_v55  ;;  %v2843_v4 = vld [vmem:[%s5488_s4 + $0x2d0] sm:$0xff]  ;;  %v2844_v5 = vld [vmem:[%s5488_s4 + $0x2d8] sm:$0xff] }
  0x23   : > { %v2826_v3 = vld [vmem:[%s5488_s4 + $0x248] sm:$0xff]  ;;  %v543_v8 = vld [vmem:[%s5486_s2 + $0x78] sm:$0xff]  ;;  %v2845_v13 = vld [vmem:[%s5488_s4 + $0x2e0] sm:$0xff] }
  0x24   : > { %3935 = vmatpush3.bf16.msra.mxu1 %v3934_v10  ;;  %v1102_v61 = vsel %vm1096_vm0, %v1100_v57, %v1101_v53  ;;  %v3990_v9 = vpack.c.bf16 %v2826_v3, %v2825_v2  ;;  %v3992_v10 = vpack.c.bf16 %v2844_v5, %v2843_v4  ;;  %v2828_v12 = vld [vmem:[%s5488_s4 + $0x258] sm:$0xff]  ;;  %v2785_v16 = vld [vmem:[%s5488_s4 + $0x180] sm:$0xff]  ;;  %v750_v19 = vld [vmem:[%s4547_s27 + $0x8] sm:$0xfe] }
  0x25   : > { %3843 = vmatpush3.bf16.msra.mxu0 %v3840_v62  ;;  %3937 = vmatprep.subr.bf16.mxu1 %v3936_v11  ;;  %v540_v62 = vld [vmem:[%s5486_s2 + $0x60] sm:$0xff]  ;;  %v2827_v11 = vld [vmem:[%s5488_s4 + $0x250] sm:$0xff]  ;;  %v2848_v24 = vld [vmem:[%s5488_s4 + $0x2f8] sm:$0xff]  ;;  %v798_v28 = vrot.slane %v750_v19, 1 }
  0x26   : > { %3845 = vmatprep.subr.bf16.mxu0 %v3844_v7  ;;  %v3868_v6 = vpack.c.bf16 %v541_v63, %v540_v62  ;;  %v2847_v23 = vld [vmem:[%s5488_s4 + $0x2f0] sm:$0xff]  ;;  %v2769_v26 = vld [vmem:[%s5488_s4 + $0x100] sm:$0xff]  ;;  %v2832_v35 = vld [vmem:[%s5488_s4 + $0x278] sm:$0xff] }
  0x27   : > { %v4000_v33 = vpack.c.bf16 %v2848_v24, %v2847_v23  ;;  %v2831_v34 = vld [vmem:[%s5488_s4 + $0x270] sm:$0xff]  ;;  %v1055_v36 = vld [vmem:[%s4547_s27] sm:$0xfc]  ;;  %v1058_v39 = vld [vmem:[%s4547_s27 + $0x28] sm:$0x3]  ;;  %v800_v43 = vsel %vm794_vm1, %v798_v28, %v799_v29 }
  0x28   : > { %3348 = vmatmul.mubr.f32.vlgmr.msra.gmra.mrb[0].mxu0 %v581_v14  ;;  %3939 = vmatpush3.bf16.msra.mxu1 %v3938_v21  ;;  %v2846_v14 = vld [vmem:[%s5488_s4 + $0x2e8] sm:$0xff]  ;;  %v2829_v21 = vld [vmem:[%s5488_s4 + $0x260] sm:$0xff]  ;;  %v2771_v41 = vld [vmem:[%s5488_s4 + $0x110] sm:$0xff]  ;;  %v1097_v50 = vrot.slane %v1055_v36, 2 }
  0x29   : > { %3847 = vmatpush3.bf16.msra.mxu0 %v3844_v7  ;;  %3382 = vmatprep.mubr.f32.mxu0 %v526_v18  ;;  %v542_v7 = vld [vmem:[%s5486_s2 + $0x70] sm:$0xff]  ;;  %v3994_v18 = vpack.c.bf16 %v2828_v12, %v2827_v11  ;;  %v3996_v20 = vpack.c.bf16 %v2846_v14, %v2845_v13  ;;  %v2789_v46 = vld [vmem:[%s5488_s4 + $0x1a0] sm:$0xff]  ;;  %v2790_v47 = vld [vmem:[%s5488_s4 + $0x1a8] sm:$0xff] }
  0x2a   : > { %3849 = vmatprep.subr.bf16.mxu0 %v3848_v17  ;;  %3973 = vmatprep.subr.bf16.mxu1 %v3972_v22  ;;  %v3872_v15 = vpack.c.bf16 %v543_v8, %v542_v7  ;;  %v2830_v22 = vld [vmem:[%s5488_s4 + $0x268] sm:$0xff]  ;;  %v1057_v52 = vld [vmem:[%s4547_s27 + $0x20] sm:$0x3]  ;;  %v3884_v55 = vpack.c.bf16 %v2790_v47, %v2789_v46  ;;  %v2791_v58 = vld [vmem:[%s5488_s4 + $0x1b0] sm:$0xff] }
  0x2b   : > { %949 = vmatmul.mubr.f32.vlgmr.msra.gmra.mrb[0].mxu1 %v544_v30  ;;  %v2787_v30 = vld [vmem:[%s5488_s4 + $0x190] sm:$0xff]  ;;  %v2773_v56 = vld [vmem:[%s5488_s4 + $0x120] sm:$0xff]  ;;  %v2774_v57 = vld [vmem:[%s5488_s4 + $0x128] sm:$0xff] }
  0x2c   : > { %3975 = vmatpush3.bf16.msra.mxu1 %v3974_v31  ;;  %953 = vmatprep.mubr.f32.mxu1 %v4656_v44  ;;  %v2788_v31 = vld [vmem:[%s5488_s4 + $0x198] sm:$0xff]  ;;  %v3886_v63 = vpack.c.bf16 %v2774_v57, %v2773_v56  ;;  %v2793_v3 = vld [vmem:[%s5488_s4 + $0x1c0] sm:$0xff]  ;;  %v2778_v8 = vld [vmem:[%s5488_s4 + $0x148] sm:$0xff] }
  0x2d   : > { %3851 = vmatpush3.bf16.msra.mxu0 %v3848_v17  ;;  %3977 = vmatprep.subr.bf16.mxu1 %v3976_v32  ;;  %v2786_v17 = vld [vmem:[%s5488_s4 + $0x188] sm:$0xff]  ;;  %v3998_v32 = vpack.c.bf16 %v2830_v22, %v2829_v21  ;;  %v2792_v59 = vld [vmem:[%s5488_s4 + $0x1b8] sm:$0xff]  ;;  %v2777_v7 = vld [vmem:[%s5488_s4 + $0x140] sm:$0xff] }
  0x2e   : > { %3853 = vmatprep.subr.bf16.mxu0 %v3852_v27  ;;  %v3876_v25 = vpack.c.bf16 %v2786_v17, %v2785_v16  ;;  %v2776_v2 = vld [vmem:[%s5488_s4 + $0x138] sm:$0xff]  ;;  %v3894_v11 = vpack.c.bf16 %v2778_v8, %v2777_v7  ;;  %v2779_v13 = vld [vmem:[%s5488_s4 + $0x150] sm:$0xff]  ;;  %v2798_v16 = vld [vmem:[%s5488_s4 + $0x1e8] sm:$0xff] }
  0x2f   : > { %954 = vmatmul.mubr.f32.gmra.mrb[2].mxu1 %v4659_v45  ;;  %v2780_v14 = vld [vmem:[%s5488_s4 + $0x158] sm:$0xff]  ;;  %v2781_v19 = vld [vmem:[%s5488_s4 + $0x160] sm:$0xff]  ;;  %v2799_v21 = vld [vmem:[%s5488_s4 + $0x1f0] sm:$0xff] }
  0x30   : > { %3979 = vmatpush3.bf16.msra.mxu1 %v3978_v40  ;;  %1175 = vmatprep.mubr.f32.mxu1 %v1102_v61  ;;  %v3880_v40 = vpack.c.bf16 %v2788_v31, %v2787_v30  ;;  %v1103_v61 = vrot.slane %v1057_v52, 2  ;;  %v3898_v17 = vpack.c.bf16 %v2780_v14, %v2779_v13  ;;  %v2800_v22 = vld [vmem:[%s5488_s4 + $0x1f8] sm:$0xff]  ;;  %v2801_v28 = vld [vmem:[%s5486_s2 + $0x100] sm:$0xff]  ;;  %v2802_v30 = vld [vmem:[%s5486_s2 + $0x108] sm:$0xff] }
  0x31   : > { %3855 = vmatpush3.bf16.msra.mxu0 %v3852_v27  ;;  %3981 = vmatprep.subr.bf16.mxu1 %v3980_v42  ;;  %v2770_v27 = vld [vmem:[%s5488_s4 + $0x108] sm:$0xff]  ;;  %v2772_v42 = vld [vmem:[%s5488_s4 + $0x118] sm:$0xff]  ;;  %v3904_v24 = vpack.c.bf16 %v2800_v22, %v2799_v21  ;;  %v2807_v44 = vld [vmem:[%s5486_s2 + $0x130] sm:$0xff] }
  0x32   : > { %3857 = vmatprep.subr.bf16.mxu0 %v3856_v37  ;;  %v3878_v38 = vpack.c.bf16 %v2770_v27, %v2769_v26  ;;  %v1104_v4 = vsel %vm1096_vm0, %v1098_v49, %v1103_v61  ;;  %v2784_v26 = vld [vmem:[%s5488_s4 + $0x178] sm:$0xff]  ;;  %v749_v27 = vld [vmem:[%s4547_s27] sm:$0xfe]  ;;  %v754_v31 = vld [vmem:[%s4547_s27 + $0x28] sm:$0x1] }
  0x33   : > { %v803_v36 = vrot.slane %v754_v31, 1  ;;  %v2806_v46 = vld [vmem:[%s5486_s2 + $0x128] sm:$0xff]  ;;  %v2812_v56 = vld [vmem:[%s5486_s2 + $0x158] sm:$0xff]  ;;  %v2815_v61 = vld [vmem:[%s5486_s2 + $0x170] sm:$0xff] }
  0x34   : > { %3983 = vmatpush3.bf16.msra.mxu1 %v3982_v51  ;;  %v1105_v51 = vrot.slane %v1058_v39, 2  ;;  %v2804_v39 = vld [vmem:[%s5486_s2 + $0x118] sm:$0xff]  ;;  %v2810_v52 = vld [vmem:[%s5486_s2 + $0x148] sm:$0xff]  ;;  %v1201_v7 = vld [vmem:[%s5490_s6 + $0x20] sm:$0xff] }
  0x35   : > { %3859 = vmatpush3.bf16.msra.mxu0 %v3856_v37  ;;  %3985 = vmatprep.subr.bf16.mxu1 %v3984_v54  ;;  %v527_v37 = vld [vmem:[%s4456_s26 + $0x8] sm:$0xff]  ;;  %v3882_v54 = vpack.c.bf16 %v2772_v42, %v2771_v41  ;;  %v1205_v13 = vld [vmem:[%s5490_s6 + $0x40] sm:$0xff]  ;;  %v1211_v22 = vld [vmem:[%s5490_s6 + $0x70] sm:$0xff] }
  0x36   : > { %3861 = vmatprep.subr.bf16.mxu0 %v3860_v48  ;;  %v1106_v62 = vsel %vm1096_vm0, %v1101_v53, %v1105_v51  ;;  %v2794_v53 = vld [vmem:[%s5488_s4 + $0x1c8] sm:$0xff]  ;;  %v2809_v51 = vld [vmem:[%s5486_s2 + $0x140] sm:$0xff] }
  0x37   : > { %v1202_v8 = vld [vmem:[%s5490_s6 + $0x28] sm:$0xff] }
  0x38   : > { %3987 = vmatpush3.bf16.msra.mxu1 %v3986_v0  ;;  %v3888_v0 = vpack.c.bf16 %v2792_v59, %v2791_v58  ;;  %v2813_v58 = vld [vmem:[%s5486_s2 + $0x160] sm:$0xff]  ;;  %v2814_v59 = vld [vmem:[%s5486_s2 + $0x168] sm:$0xff] }
  0x39   : > { %3863 = vmatpush3.bf16.msra.mxu0 %v3860_v48  ;;  %3989 = vmatprep.subr.bf16.mxu1 %v3988_v1  ;;  %v4002_v48 = vpack.c.bf16 %v2832_v35, %v2831_v34  ;;  %v2775_v1 = vld [vmem:[%s5488_s4 + $0x130] sm:$0xff]  ;;  %v796_v34 = vrot.slane %v4659_v45, 1  ;;  %v3940_v35 = vpack.c.bf16 %v2802_v30, %v2801_v28  ;;  %v804_v45 = vsel %vm794_vm1, %v799_v29, %v803_v36  ;;  %v2808_v29 = vld [vmem:[%s5486_s2 + $0x138] sm:$0xff]  ;;  %v1206_v14 = vld [vmem:[%s5490_s6 + $0x48] sm:$0xff] }
  0x3a   : > { %3865 = vmatprep.subr.bf16.mxu0 %v3864_v60  ;;  %v3890_v5 = vpack.c.bf16 %v2776_v2, %v2775_v1  ;;  %v1197_v1 = vld [vmem:[%s5490_s6] sm:$0xff]  ;;  %v1198_v2 = vld [vmem:[%s5490_s6 + $0x8] sm:$0xff] }
  0x3c   : > { %3991 = vmatpush3.bf16.msra.mxu1 %v3990_v9  ;;  %v2795_v9 = vld [vmem:[%s5488_s4 + $0x1d0] sm:$0xff] }
  0x3d   : > { %3867 = vmatpush3.bf16.msra.mxu0 %v3864_v60  ;;  %3993 = vmatprep.subr.bf16.mxu1 %v3992_v10  ;;  %v1099_v60 = vsel %vm1096_vm0, %v1097_v50, %v1098_v49  ;;  %v2796_v10 = vld [vmem:[%s5488_s4 + $0x1d8] sm:$0xff]  ;;  %v959_v49 = vld [vmem:[%s4456_s26 + $0x2] sm:$0xff]  ;;  %v3952_v50 = vpack.c.bf16 %v2808_v29, %v2807_v44  ;;  %v2849_v44 = vld [vmem:[%s5493_s9] ss:$0 sm:$0xff] }
  0x3e   : > { %3869 = vmatprep.subr.bf16.mxu0 %v3868_v6  ;;  %v3896_v12 = vpack.c.bf16 %v2796_v10, %v2795_v9  ;;  %v4011_v9 = vpack.c.bf16 %v1202_v8, %v1201_v7  ;;  %v1203_v10 = vld [vmem:[%s5490_s6 + $0x30] sm:$0xff] }
  0x40   : > { %3995 = vmatpush3.bf16.msra.mxu1 %v3994_v18 }
  0x41   : > { %3871 = vmatpush3.bf16.msra.mxu0 %v3868_v6  ;;  %3997 = vmatprep.subr.bf16.mxu1 %v3996_v20  ;;  %v3892_v6 = vpack.c.bf16 %v2794_v53, %v2793_v3  ;;  %v2782_v20 = vld [vmem:[%s5488_s4 + $0x168] sm:$0xff]  ;;  %v1199_v3 = vld [vmem:[%s5490_s6 + $0x10] sm:$0xff]  ;;  %v4335_v53 = vmov 0.0|0.0  }
  0x42   : > { %3873 = vmatprep.subr.bf16.mxu0 %v3872_v15  ;;  %v3902_v23 = vpack.c.bf16 %v2782_v20, %v2781_v19  ;;  %v1209_v19 = vld [vmem:[%s5490_s6 + $0x60] sm:$0xff]  ;;  %v1210_v20 = vld [vmem:[%s5490_s6 + $0x68] sm:$0xff] }
  0x43   : > { %v4023_v21 = vpack.c.bf16 %v1210_v20, %v1209_v19 }
  0x44   : > { %3999 = vmatpush3.bf16.msra.mxu1 %v3998_v32 }
  0x45   : > { %3875 = vmatpush3.bf16.msra.mxu0 %v3872_v15  ;;  %4001 = vmatprep.subr.bf16.mxu1 %v4000_v33  ;;  %v2797_v15 = vld [vmem:[%s5488_s4 + $0x1e0] sm:$0xff]  ;;  %v795_v33 = vrot.slane %v749_v27, 1 }
  0x46   : > { %3877 = vmatprep.subr.bf16.mxu0 %v3876_v25  ;;  %v3900_v18 = vpack.c.bf16 %v2798_v16, %v2797_v15  ;;  %v2783_v25 = vld [vmem:[%s5488_s4 + $0x170] sm:$0xff]  ;;  %v4017_v15 = vpack.c.bf16 %v1206_v14, %v1205_v13 }
  0x47   : > { %v3906_v32 = vpack.c.bf16 %v2784_v26, %v2783_v25  ;;  %v1207_v16 = vld [vmem:[%s5490_s6 + $0x50] sm:$0xff]  ;;  %v4337_v25 = vmov 0.0  }
  0x48   : > { %3383 = vmatmul.mubr.f32.vlgmr.msra.gmra.mrb[0].mxu0 %v527_v37  ;;  %4003 = vmatpush3.bf16.msra.mxu1 %v4002_v48  ;;  %v753_v37 = vld [vmem:[%s4547_s27 + $0x20] sm:$0x1] }
  0x49   : > { %3879 = vmatpush3.bf16.msra.mxu0 %v3878_v38  ;;  %873 = vmatprep.mubr.f32.mxu0 %v800_v43  ;;  %v2803_v38 = vld [vmem:[%s5486_s2 + $0x110] sm:$0xff]  ;;  %v801_v41 = vrot.slane %v753_v37, 1  ;;  %v2805_v43 = vld [vmem:[%s5486_s2 + $0x120] sm:$0xff] }
  0x4a   : > { %3881 = vmatprep.subr.bf16.mxu0 %v3880_v40  ;;  %v797_v40 = vsel %vm794_vm1, %v795_v33, %v796_v34  ;;  %v3944_v42 = vpack.c.bf16 %v2804_v39, %v2803_v38  ;;  %v3948_v48 = vpack.c.bf16 %v2806_v46, %v2805_v43  ;;  %4028 = vmatprep.subr.bf16.mxu1 %v4335_v53 }
  0x4b   : > { %1176 = vmatmul.mubr.f32.vlgmr.msra.gmra.mrb[4].mxu1 %v1099_v60  ;;  %v802_v47 = vsel %vm794_vm1, %v796_v34, %v801_v41  ;;  %v3964_v60 = vpack.c.bf16 %v2814_v59, %v2813_v58 }
  0x4c   : > { %1180 = vmatprep.mubr.f32.mxu1 %v1106_v62  ;;  %v2816_v62 = vld [vmem:[%s5486_s2 + $0x178] sm:$0xff] }
  0x4d   : > { %3883 = vmatpush3.bf16.msra.mxu0 %v3882_v54  ;;  %v3956_v54 = vpack.c.bf16 %v2810_v52, %v2809_v51 }
  0x4e   : > { %3885 = vmatprep.subr.bf16.mxu0 %v3884_v55  ;;  %v2811_v55 = vld [vmem:[%s5486_s2 + $0x150] sm:$0xff] }
  0x4f   : > { %1181 = vmatmul.mubr.f32.gmra.mrb[6].mxu1 %v1104_v4  ;;  %v3960_v57 = vpack.c.bf16 %v2812_v56, %v2811_v55  ;;  %v4005_v4 = vpack.c.bf16 %v1198_v2, %v1197_v1 }
  0x50   : > { %3487 = vmatprep.mubr.msk.f32.mxu1 %vm4336_vm2, %v4337_v25 }
  0x51   : > { %3887 = vmatpush3.bf16.msra.mxu0 %v3886_v63  ;;  %v3968_v63 = vpack.c.bf16 %v2816_v62, %v2815_v61  ;;  %4030 = vmatpush3.bf16.msra.mxu1 %v4005_v4  ;;  %v1291_v61 = vlaneseq }
  0x52   : > { %3889 = vmatprep.subr.bf16.mxu0 %v3888_v0  ;;  %v960_v0 = vld [vmem:[%s4456_s26 + $0xa] sm:$0xff]  ;;  %4031 = vmatprep.subr.bf16.mxu1 %v4335_v53 }
  0x53   : > { %v1292_v62 = vshrl.u32 %v1291_v61, 7 }
  0x55   : > { %3891 = vmatpush3.bf16.msra.mxu0 %v3890_v5  ;;  %v1200_v5 = vld [vmem:[%s5490_s6 + $0x18] sm:$0xff] }
  0x56   : > { %3893 = vmatprep.subr.bf16.mxu0 %v3892_v6  ;;  %v4008_v6 = vpack.c.bf16 %v1200_v5, %v1199_v3 }
  0x58   : > { %4033 = vmatpush3.bf16.msra.mxu1 %v4008_v6 }
  0x59   : > { %3895 = vmatpush3.bf16.msra.mxu0 %v3894_v11  ;;  %v1204_v11 = vld [vmem:[%s5490_s6 + $0x38] sm:$0xff]  ;;  %4034 = vmatprep.subr.bf16.mxu1 %v4335_v53 }
  0x5a   : > { %3897 = vmatprep.subr.bf16.mxu0 %v3896_v12  ;;  %v4014_v12 = vpack.c.bf16 %v1204_v11, %v1203_v10 }
  0x5c   : > { %4036 = vmatpush3.bf16.msra.mxu1 %v4011_v9 }
  0x5d   : > { %3899 = vmatpush3.bf16.msra.mxu0 %v3898_v17  ;;  %4037 = vmatprep.subr.bf16.mxu1 %v4335_v53  ;;  %v1208_v17 = vld [vmem:[%s5490_s6 + $0x58] sm:$0xff] }
  0x5e   : > { %3901 = vmatprep.subr.bf16.mxu0 %v3900_v18  ;;  %v4020_v18 = vpack.c.bf16 %v1208_v17, %v1207_v16 }
  0x60   : > { %4039 = vmatpush3.bf16.msra.mxu1 %v4014_v12 }
  0x61   : > { %3903 = vmatpush3.bf16.msra.mxu0 %v3902_v23  ;;  %4040 = vmatprep.subr.bf16.mxu1 %v4335_v53  ;;  %v1212_v23 = vld [vmem:[%s5490_s6 + $0x78] sm:$0xff] }
  0x62   : > { %3905 = vmatprep.subr.bf16.mxu0 %v3904_v24  ;;  %v4026_v24 = vpack.c.bf16 %v1212_v23, %v1211_v22 }
  0x64   : > { %4042 = vmatpush3.bf16.msra.mxu1 %v4017_v15 }
  0x65   : > { %3907 = vmatpush3.bf16.msra.mxu0 %v3906_v32  ;;  %4043 = vmatprep.subr.bf16.mxu1 %v4335_v53 }
  0x66   : > { %3941 = vmatprep.subr.bf16.mxu0 %v3940_v35 }
  0x68   : > { %874 = vmatmul.mubr.f32.vlgmr.msra.gmra.mrb[2].mxu0 %v797_v40  ;;  %4045 = vmatpush3.bf16.msra.mxu1 %v4020_v18 }
  0x69   : > { %3943 = vmatpush3.bf16.msra.mxu0 %v3940_v35  ;;  %878 = vmatprep.mubr.f32.mxu0 %v804_v45 }
  0x6a   : > { %3945 = vmatprep.subr.bf16.mxu0 %v3944_v42  ;;  %4046 = vmatprep.subr.bf16.mxu1 %v4335_v53 }
  0x6c   : > { %879 = vmatmul.mubr.f32.gmra.mrb[4].mxu0 %v802_v47  ;;  %4048 = vmatpush3.bf16.msra.mxu1 %v4023_v21 }
  0x6d   : > { %3947 = vmatpush3.bf16.msra.mxu0 %v3944_v42  ;;  %3417 = vmatprep.mubr.f32.mxu0 %v959_v49 }
  0x6e   : > { %3949 = vmatprep.subr.bf16.mxu0 %v3948_v48  ;;  %4049 = vmatprep.subr.bf16.mxu1 %v4335_v53 }
  0x70   : > { %4051 = vmatpush3.bf16.msra.mxu1 %v4026_v24 }
  0x71   : > { %3951 = vmatpush3.bf16.msra.mxu0 %v3948_v48 }
  0x72   : > { %3953 = vmatprep.subr.bf16.mxu0 %v3952_v50 }
  0x75   : > { %3955 = vmatpush3.bf16.msra.mxu0 %v3952_v50 }
  0x76   : > { %3957 = vmatprep.subr.bf16.mxu0 %v3956_v54 }
  0x79   : > { %3959 = vmatpush3.bf16.msra.mxu0 %v3956_v54 }
  0x7a   : > { %3961 = vmatprep.subr.bf16.mxu0 %v3960_v57 }
  0x7d   : > { %3963 = vmatpush3.bf16.msra.mxu0 %v3960_v57 }
  0x7e   : > { %3965 = vmatprep.subr.bf16.mxu0 %v3964_v60 }
  0x81   : > { %3967 = vmatpush3.bf16.msra.mxu0 %v3964_v60 }
  0x82   : > { %3969 = vmatprep.subr.bf16.mxu0 %v3968_v63 }
  0x85   : > { %3971 = vmatpush3.bf16.msra.mxu0 %v3968_v63  ;;  %v1293_v63 = vsub.s32 0, %v1292_v62 }
  0x86   : > { %4004 = vmatprep.subr.bf16.mxu0 %v4335_v53 }
  0x88   : > { %3418 = vmatmul.mubr.f32.vlgmr.msra.gmra.mrb[0].mxu0 %v960_v0 }
  0x89   : > { %4006 = vmatpush3.bf16.msra.mxu0 %v4005_v4  ;;  %3452 = vmatprep.mubr.msk.f32.mxu0 %vm4336_vm2, %v4337_v25 }
  0x8a   : > { %4007 = vmatprep.subr.bf16.mxu0 %v4335_v53 }
  0x8d   : > { %4009 = vmatpush3.bf16.msra.mxu0 %v4008_v6 }
  0x8e   : > { %4010 = vmatprep.subr.bf16.mxu0 %v4335_v53 }
  0x91   : > { %4012 = vmatpush3.bf16.msra.mxu0 %v4011_v9 }
  0x92   : > { %4013 = vmatprep.subr.bf16.mxu0 %v4335_v53 }
  0x95   : > { %4015 = vmatpush3.bf16.msra.mxu0 %v4014_v12 }
  0x96   : > { %4016 = vmatprep.subr.bf16.mxu0 %v4335_v53 }
  0x99   : > { %4018 = vmatpush3.bf16.msra.mxu0 %v4017_v15  ;;  %v1404_v15 = vand.u32 127, %v1291_v61 }
  0x9a   : > { %4019 = vmatprep.subr.bf16.mxu0 %v4335_v53 }
  0x9b   : > { %v1420_v16 = vadd.s32 1, %v1404_v15 }
  0x9d   : > { %4021 = vmatpush3.bf16.msra.mxu0 %v4020_v18  ;;  %vm1421_vm3 = vcmp.eq.s32.totalorder %v1292_v62, %v1420_v16  ;;  %v2854_v18 = vadd.s32 4294967295, %v1404_v15 }
  0x9e   : > { %4022 = vmatprep.subr.bf16.mxu0 %v4335_v53  ;;  %v2852_v17 = vsel %vm1421_vm3, 1.0, %v4337_v25 }
  0x9f   : > { %vm1428_vm5 = vcmp.eq.s32.totalorder %v1292_v62, %v2854_v18 }
  0xa0   : > { %v2855_v19 = vsel %vm1428_vm5, 1.0, %v4337_v25 }
  0xa1   : > { %4024 = vmatpush3.bf16.msra.mxu0 %v4023_v21 }
  0xa2   : > { %4025 = vmatprep.subr.bf16.mxu0 %v4335_v53 }
  0xa5   : > { %4027 = vmatpush3.bf16.msra.mxu0 %v4026_v24 }
  0xfe   : > { %v3059_v26 = vpop.f32.mrb[0].mxu1 }
  0xff   : > { %v3060_v27 = vpop.f32.mrb[1].mxu1 }
 0x100   : > { %v3061_v28 = vadd.f32 %v3060_v27, %v3059_v26  ;;  %v2850_v27 = vld [vmem:[%s5496_s12] ss:$0 sm:$0xff] }
 0x102   : > { %v3062_v30 = vpop.f32.mrb[2].mxu1 }
 0x103   : > { %v3063_v31 = vpop.f32.mrb[3].mxu1 }
 0x104   : > { %v3064_v32 = vadd.f32 %v3063_v31, %v3062_v30 }
 0x11e   : > { %v3115_v33 = vpop.f32.mrb[4].mxu1 }
 0x11f   : > { %v3116_v34 = vpop.f32.mrb[5].mxu1 }
 0x120   : > { %v3117_v35 = vadd.f32 %v3116_v34, %v3115_v33 }
 0x122   : > { %v3118_v36 = vpop.f32.mrb[6].mxu1 }
 0x123   : > { %v3119_v37 = vpop.f32.mrb[7].mxu1 }
 0x124   : > { %v3120_v38 = vadd.f32 %v3119_v37, %v3118_v36 }
 0x13b   : > { %v3021_v39 = vpop.f32.mrb[2].mxu0 }
 0x13c   : > { %v3022_v40 = vpop.f32.mrb[3].mxu0 }
 0x13d   : > { %v3023_v41 = vadd.f32 %v3022_v40, %v3021_v39  ;;  %v1419_v39 = vadd.s32 8, %v1292_v62  ;;  %v2861_v40 = vld [vmem:[%s5487_s3 + $0x80] sm:$0xff] }
 0x13e   : > { %v2869_v62 = vld [vmem:[%s5487_s3 + $0xc0] sm:$0xff] }
 0x13f   : > { %v951_v42 = vadd.f32 %v3061_v28, %v3023_v41  ;;  %v3024_v45 = vpop.f32.mrb[4].mxu0  ;;  %v1405_v28 = vand.u32 7, %v1404_v15  ;;  %v2862_v41 = vld [vmem:[%s5487_s3 + $0x88] sm:$0xff]  ;;  %vm1422_vm9 = vcmp.eq.s32.totalorder %v1419_v39, %v1420_v16  ;;  %vm1429_vm10 = vcmp.eq.s32.totalorder %v1419_v39, %v2854_v18  ;;  %v1601_v16 = vld [vmem:[%s5487_s3 + $0x20] sm:$0xff] }
 0x140   : > { %v3025_v43 = vpop.f32.mrb[5].mxu0  ;;  %v1889_v39 = vld [vmem:[%s5489_s5] sm:$0xff] }
 0x141   : > { %v4984_v46 = vadd.f32 %v3117_v35, %v951_v42  ;;  %v3026_v47 = vadd.f32 %v3025_v43, %v3024_v45  ;;  %vm1406_vm6 = vcmp.lt.s32.totalorder %v1405_v28, 4 }
 0x143   : > { %v956_v48 = vadd.f32 %v3064_v32, %v3026_v47  ;;  %v2851_v32 = vld [vmem:[%s5497_s13] ss:$0 sm:$0xff] }
 0x145   : > { %v4986_v49 = vadd.f32 %v3120_v38, %v956_v48 }
 0x15b   : > { %v3419_v29 = vpop.f32.mrb[0].mxu0 }
 0x15c   : > { %v1196_v50 = vadd.f32 %v3419_v29, %v2849_v44  ;;  %v1044_v51 = vpop.f32.mrb[1].mxu0  ;;  %v2863_v29 = vld [vmem:[%s5487_s3 + $0x90] sm:$0xff] }
 0x15d   : > { %v1195_v52 = vadd.f32 %v2849_v44, %v1044_v51  ;;  %v4060_v44 = vpack.c.bf16 %v2862_v41, %v2861_v40  ;;  %v2853_v51 = vsel %vm1422_vm9, 1.0, %v4337_v25  ;;  %v1890_v40 = vld [vmem:[%s5489_s5 + $0x8] sm:$0xff] }
 0x15e   : > { %v4156_v41 = vpack.c.bf16 %v1890_v40, %v1889_v39 }
 0x15f   : > { %v1213_v54 = vadd.f32 %v1196_v50, %v1195_v52 }
 0x161   : > { %v1214_v55 = vrot.slane %v1213_v54, 4 }
 0x163   : > { %v1215_v56 = vadd.f32 %v1214_v55, %v1213_v54  ;;  %v2865_v55 = vld [vmem:[%s5487_s3 + $0xa0] sm:$0xff] }
 0x165   : > { %v1216_v57 = vrot.slane %v1215_v56, 2 }
 0x167   : > { %v1217_v58 = vadd.f32 %v1216_v57, %v1215_v56  ;;  %v2866_v56 = vld [vmem:[%s5487_s3 + $0xa8] sm:$0xff] }
 0x168   : > { %v4068_v57 = vpack.c.bf16 %v2866_v56, %v2865_v55  ;;  %v1899_v56 = vld [vmem:[%s5489_s5 + $0x50] sm:$0xff] }
 0x169   : > { %v1218_v59 = vrot.slane %v1217_v58, 1 }
 0x16b   : > { %v1219_v60 = vadd.f32 %v1218_v59, %v1217_v58  ;;  %v4325_v58 = vld [vmem:[%s4456_s26 + $0x1] sm:$0xff]  ;;  %v2867_v59 = vld [vmem:[%s5487_s3 + $0xb0] sm:$0xff] }
 0x16d   : > { %3453 = vmatmul.mubr.f32.vlgmr.msra.gmra.mrb[6].mxu0 %v1219_v60  ;;  %v2868_v60 = vld [vmem:[%s5487_s3 + $0xb8] sm:$0xff] }
 0x16e   : > { %3494 = vmatprep.mubr.msk.f32.mxu0 %vm1434_vm4, %v2852_v17  ;;  %v4072_v61 = vpack.c.bf16 %v2868_v60, %v2867_v59  ;;  %v1602_v17 = vld [vmem:[%s5487_s3 + $0x28] sm:$0xff]  ;;  %v1901_v59 = vld [vmem:[%s5489_s5 + $0x60] sm:$0xff] }
 0x16f   : > { %v4100_v18 = vpack.c.bf16 %v1602_v17, %v1601_v16  ;;  %v1902_v60 = vld [vmem:[%s5489_s5 + $0x68] sm:$0xff] }
 0x170   : > { %v2886_v16 = vld [vmem:[%s5487_s3 + $0x148] sm:$0xff] }
 0x240   : > { %v1286_v0 = vpop.f32.mrb[6].mxu0 }
 0x241   : > { %v1290_v1 = vmul.f32 0.00390625, %v1286_v0  ;;  %v3454_v2 = vpop.f32.mrb[7].mxu0 }
 0x242   : > { %v2872_v2 = vld [vmem:[%s5487_s3 + $0xd8] sm:$0xff] }
 0x243   : > { %v1294_v3 = vrot.slane %v1290_v1, %v1293_v63  ;;  %v2871_v1 = vld [vmem:[%s5487_s3 + $0xd0] sm:$0xff] }
 0x245   : > { %v1295_v4 = vsub.f32 %v1195_v52, %v1294_v3  ;;  %v1296_v5 = vsub.f32 %v1196_v50, %v1294_v3  ;;  %v4080_v3 = vpack.c.bf16 %v2872_v2, %v2871_v1  ;;  %v4326_v1 = vld [vmem:[%s4456_s26 + $0x9] sm:$0xff] }
 0x246   : > { %v2879_v2 = vld [vmem:[%s5487_s3 + $0x110] sm:$0xff] }
 0x247   : > { %v1297_v6 = vmul.f32 %v1295_v4, %v1295_v4  ;;  %v1298_v7 = vmul.f32 %v1296_v5, %v1296_v5 }
 0x249   : > { %v1299_v8 = vadd.f32 %v1298_v7, %v1297_v6  ;;  %v2875_v7 = vld [vmem:[%s5487_s3 + $0xf0] sm:$0xff] }
 0x24b   : > { %v1300_v9 = vrot.slane %v1299_v8, 4 }
 0x24d   : > { %v1301_v10 = vadd.f32 %v1300_v9, %v1299_v8  ;;  %v2876_v8 = vld [vmem:[%s5487_s3 + $0xf8] sm:$0xff] }
 0x24e   : > { %v4088_v9 = vpack.c.bf16 %v2876_v8, %v2875_v7 }
 0x24f   : > { %v1302_v11 = vrot.slane %v1301_v10, 2 }
 0x251   : > { %v1303_v12 = vadd.f32 %v1302_v11, %v1301_v10  ;;  %v1597_v10 = vld [vmem:[%s5487_s3] sm:$0xff]  ;;  %v1598_v11 = vld [vmem:[%s5487_s3 + $0x8] sm:$0xff] }
 0x253   : > { %v1304_v13 = vrot.slane %v1303_v12, 1 }
 0x255   : > { %v1305_v14 = vadd.f32 %v1304_v13, %v1303_v12  ;;  %v4092_v12 = vpack.c.bf16 %v1598_v11, %v1597_v10  ;;  %v1599_v13 = vld [vmem:[%s5487_s3 + $0x10] sm:$0xff]  ;;  %v2882_v10 = vld [vmem:[%s5487_s3 + $0x128] sm:$0xff] }
 0x257   : > { %3488 = vmatmul.mubr.f32.vlgmr.msra.gmra.mrb[8].mxu1 %v1305_v14  ;;  %v1600_v14 = vld [vmem:[%s5487_s3 + $0x18] sm:$0xff] }
 0x258   : > { %3501 = vmatprep.mubr.msk.f32.mxu1 %vm1434_vm4, %v2855_v19  ;;  %v4096_v15 = vpack.c.bf16 %v1600_v14, %v1599_v13  ;;  %v1603_v19 = vld [vmem:[%s5487_s3 + $0x30] sm:$0xff]  ;;  %v2884_v13 = vld [vmem:[%s5487_s3 + $0x138] sm:$0xff] }
 0x32a   : > { %v1372_v20 = vpop.f32.mrb[8].mxu1 }
 0x32b   : > { %v1376_v21 = vmul.f32 0.00390625, %v1372_v20  ;;  %v3489_v22 = vpop.f32.mrb[9].mxu1  ;;  %v1604_v20 = vld [vmem:[%s5487_s3 + $0x38] sm:$0xff] }
 0x32c   : > { %v1605_v22 = vld [vmem:[%s5487_s3 + $0x40] sm:$0xff] }
 0x32d   : > { %v1377_v23 = vadd.f32 1e-05, %v1376_v21  ;;  %v4104_v21 = vpack.c.bf16 %v1604_v20, %v1603_v19  ;;  %v2888_v19 = vld [vmem:[%s5487_s3 + $0x158] sm:$0xff] }
 0x32f   : > { %4323 = vrsqrt.f32 %v1377_v23  ;;  %v1606_v23 = vld [vmem:[%s5487_s3 + $0x48] sm:$0xff] }
 0x339   : > { %v4324_v24 = vpop.eup %4323 }
 0x33a   : > { %v1382_v26 = vrot.slane %v4324_v24, %v1293_v63  ;;  %v2870_v63 = vld [vmem:[%s5487_s3 + $0xc8] sm:$0xff]  ;;  %v4108_v24 = vpack.c.bf16 %v1606_v23, %v1605_v22 }
 0x33b   : > { %v4076_v0 = vpack.c.bf16 %v2870_v63, %v2869_v62  ;;  %v1903_v62 = vld [vmem:[%s5489_s5 + $0x70] sm:$0xff]  ;;  %v1904_v63 = vld [vmem:[%s5489_s5 + $0x78] sm:$0xff]  ;;  %v2890_v22 = vld [vmem:[%s5487_s3 + $0x168] sm:$0xff] }
 0x33c   : > { %v1383_v30 = vmul.f32 %v1382_v26, %v1295_v4  ;;  %v1384_v31 = vmul.f32 %v1382_v26, %v1296_v5  ;;  %v2873_v4 = vld [vmem:[%s5487_s3 + $0xe0] sm:$0xff]  ;;  %v2874_v5 = vld [vmem:[%s5487_s3 + $0xe8] sm:$0xff]  ;;  %v1607_v26 = vld [vmem:[%s5487_s3 + $0x50] sm:$0xff] }
 0x33d   : > { %v4084_v6 = vpack.c.bf16 %v2874_v5, %v2873_v4 }
 0x33e   : > { %v1392_v33 = vmul.f32 %v2850_v27, %v1383_v30  ;;  %v1393_v34 = vmul.f32 %v2850_v27, %v1384_v31  ;;  %v1608_v27 = vld [vmem:[%s5487_s3 + $0x58] sm:$0xff]  ;;  %v1609_v30 = vld [vmem:[%s5487_s3 + $0x60] sm:$0xff]  ;;  %v1610_v31 = vld [vmem:[%s5487_s3 + $0x68] sm:$0xff] }
 0x33f   : > { %v4112_v28 = vpack.c.bf16 %v1608_v27, %v1607_v26  ;;  %v2892_v26 = vld [vmem:[%s5487_s3 + $0x178] sm:$0xff] }
 0x340   : > { %v1401_v35 = vadd.f32 %v2851_v32, %v1392_v33  ;;  %v1402_v36 = vadd.f32 %v2851_v32, %v1393_v34  ;;  %v4116_v32 = vpack.c.bf16 %v1610_v31, %v1609_v30  ;;  %v1611_v33 = vld [vmem:[%s5487_s3 + $0x70] sm:$0xff]  ;;  %v1612_v34 = vld [vmem:[%s5487_s3 + $0x78] sm:$0xff]  ;;  %v2893_v31 = vld [vmem:[%s5494_s10] ss:$0 sm:$0xff] }
 0x342   : > { %v1409_v37 = vsel %vm1406_vm6, %v1401_v35, %v1195_v52  ;;  %v1410_v38 = vsel %vm1406_vm6, %v1402_v36, %v1196_v50  ;;  %v2864_v50 = vld [vmem:[%s5487_s3 + $0x98] sm:$0xff]  ;;  %v2856_v52 = vsel %vm1429_vm10, 1.0, %v4337_v25  ;;  %v4120_v35 = vpack.c.bf16 %v1612_v34, %v1611_v33  ;;  %v2877_v36 = vld [vmem:[%s5487_s3 + $0x100] sm:$0xff] }
 0x343   : > { %vm1411_vm7 = vcmp.ge.f32.partialorder %v1409_v37, 0.0  ;;  %vm1412_vm8 = vcmp.ge.f32.partialorder %v1410_v38, 0.0  ;;  %v1413_v42 = vmul.f32 0.2, %v1409_v37  ;;  %v1414_v45 = vmul.f32 0.2, %v1410_v38 }
 0x344   : > { %v4064_v54 = vpack.c.bf16 %v2864_v50, %v2863_v29  ;;  %v1895_v29 = vld [vmem:[%s5489_s5 + $0x30] sm:$0xff]  ;;  %v1896_v50 = vld [vmem:[%s5489_s5 + $0x38] sm:$0xff] }
 0x345   : > { %v1415_v43 = vsel %vm1411_vm7, %v1409_v37, %v1413_v42  ;;  %v1416_v47 = vsel %vm1412_vm8, %v1410_v38, %v1414_v45  ;;  %v2878_v37 = vld [vmem:[%s5487_s3 + $0x108] sm:$0xff]  ;;  %v1891_v42 = vld [vmem:[%s5489_s5 + $0x10] sm:$0xff]  ;;  %v1892_v45 = vld [vmem:[%s5489_s5 + $0x18] sm:$0xff] }
 0x346   : > { %v4052_v48 = vpack.c.bf16 %v1416_v47, %v1415_v43  ;;  %v4124_v38 = vpack.c.bf16 %v2878_v37, %v2877_v36 }
 0x348   : > { %4053 = vmatprep.subr.bf16.mxu0 %v4052_v48  ;;  %4057 = vmatprep.subr.bf16.mxu1 %v4052_v48 }
 0x349   : > { %4055 = vmatpush3.bf16.msra.mxu0 %v4052_v48  ;;  %4059 = vmatpush3.bf16.msra.mxu1 %v4052_v48  ;;  %v1894_v48 = vld [vmem:[%s5489_s5 + $0x28] sm:$0xff] }
 0x34a   : > { %4061 = vmatprep.subr.bf16.mxu0 %v4060_v44  ;;  %4157 = vmatprep.subr.bf16.mxu1 %v4156_v41 }
 0x34c   : > { %3495 = vmatmul.mubr.msk.f32.vlgmr.msra.gmra.mrb[8].mxu0 %vm1434_vm4, %v2853_v51  ;;  %3502 = vmatmul.mubr.msk.f32.vlgmr.msra.gmra.mrb[10].mxu1 %vm1434_vm4, %v2856_v52  ;;  %v4168_v51 = vpack.c.bf16 %v1896_v50, %v1895_v29  ;;  %v1897_v52 = vld [vmem:[%s5489_s5 + $0x40] sm:$0xff]  ;;  %v2899_v50 = vld [vmem:[%s5491_s7 + $0x88] sm:$0xff] }
 0x34d   : > { %4063 = vmatpush3.bf16.msra.mxu0 %v4060_v44  ;;  %3536 = vmatprep.mubr.f32.mxu0 %v1415_v43  ;;  %v4160_v43 = vpack.c.bf16 %v1892_v45, %v1891_v42  ;;  %v1995_v29 = vld [vmem:[%s5492_s8] sm:$0xff] }
 0x34e   : > { %4065 = vmatprep.subr.bf16.mxu0 %v4064_v54  ;;  %3641 = vmatprep.mubr.f32.mxu1 %v4325_v58 }
 0x34f   : > { %4159 = vmatpush3.bf16.msra.mxu1 %v4156_v41  ;;  %v2894_v41 = vld [vmem:[%s5495_s11] ss:$0 sm:$0xff] }
 0x350   : > { %4161 = vmatprep.subr.bf16.mxu1 %v4160_v43 }
 0x351   : > { %4067 = vmatpush3.bf16.msra.mxu0 %v4064_v54  ;;  %v1898_v54 = vld [vmem:[%s5489_s5 + $0x48] sm:$0xff] }
 0x352   : > { %4069 = vmatprep.subr.bf16.mxu0 %v4068_v57  ;;  %v4172_v55 = vpack.c.bf16 %v1898_v54, %v1897_v52  ;;  %v2932_v52 = vld [vmem:[%s5492_s8 + $0x18] sm:$0xff] }
 0x353   : > { %4163 = vmatpush3.bf16.msra.mxu1 %v4160_v43 }
 0x355   : > { %4071 = vmatpush3.bf16.msra.mxu0 %v4068_v57  ;;  %v1900_v57 = vld [vmem:[%s5489_s5 + $0x58] sm:$0xff] }
 0x356   : > { %4073 = vmatprep.subr.bf16.mxu0 %v4072_v61  ;;  %v4176_v58 = vpack.c.bf16 %v1900_v57, %v1899_v56  ;;  %v2901_v56 = vld [vmem:[%s5491_s7 + $0x98] sm:$0xff] }
 0x359   : > { %4075 = vmatpush3.bf16.msra.mxu0 %v4072_v61  ;;  %v4180_v61 = vpack.c.bf16 %v1902_v60, %v1901_v59  ;;  %v2903_v59 = vld [vmem:[%s5491_s7 + $0xa8] sm:$0xff] }
 0x35a   : > { %4077 = vmatprep.subr.bf16.mxu0 %v4076_v0 }
 0x35d   : > { %4079 = vmatpush3.bf16.msra.mxu0 %v4076_v0  ;;  %v4184_v0 = vpack.c.bf16 %v1904_v63, %v1903_v62  ;;  %v2905_v62 = vld [vmem:[%s5491_s7 + $0xb8] sm:$0xff] }
 0x35e   : > { %4081 = vmatprep.subr.bf16.mxu0 %v4080_v3 }
 0x361   : > { %4083 = vmatpush3.bf16.msra.mxu0 %v4080_v3  ;;  %v2880_v3 = vld [vmem:[%s5487_s3 + $0x118] sm:$0xff] }
 0x362   : > { %4085 = vmatprep.subr.bf16.mxu0 %v4084_v6  ;;  %v4128_v7 = vpack.c.bf16 %v2880_v3, %v2879_v2  ;;  %v2908_v3 = vld [vmem:[%s5491_s7 + $0xd0] sm:$0xff] }
 0x365   : > { %4087 = vmatpush3.bf16.msra.mxu0 %v4084_v6 }
 0x366   : > { %4089 = vmatprep.subr.bf16.mxu0 %v4088_v9 }
 0x369   : > { %4091 = vmatpush3.bf16.msra.mxu0 %v4088_v9  ;;  %v2881_v9 = vld [vmem:[%s5487_s3 + $0x120] sm:$0xff] }
 0x36a   : > { %4093 = vmatprep.subr.bf16.mxu0 %v4092_v12  ;;  %v4132_v11 = vpack.c.bf16 %v2882_v10, %v2881_v9  ;;  %v2912_v9 = vld [vmem:[%s5491_s7 + $0xf0] sm:$0xff]  ;;  %v2913_v10 = vld [vmem:[%s5491_s7 + $0xf8] sm:$0xff] }
 0x36c   : > { %3537 = vmatmul.mubr.f32.vlgmr.msra.gmra.mrb[10].mxu0 %v1416_v47  ;;  %v1893_v47 = vld [vmem:[%s5489_s5 + $0x20] sm:$0xff] }
 0x36d   : > { %4095 = vmatpush3.bf16.msra.mxu0 %v4092_v12  ;;  %v4164_v44 = vpack.c.bf16 %v1894_v48, %v1893_v47  ;;  %v2883_v12 = vld [vmem:[%s5487_s3 + $0x130] sm:$0xff] }
 0x36e   : > { %4097 = vmatprep.subr.bf16.mxu0 %v4096_v15  ;;  %v4136_v14 = vpack.c.bf16 %v2884_v13, %v2883_v12  ;;  %v2069_v12 = vld [vmem:[%s5491_s7] sm:$0xff]  ;;  %v2070_v13 = vld [vmem:[%s5491_s7 + $0x8] sm:$0xff] }
 0x36f   : > { %4165 = vmatprep.subr.bf16.mxu1 %v4164_v44 }
 0x370   : > { %4167 = vmatpush3.bf16.msra.mxu1 %v4164_v44 }
 0x371   : > { %4099 = vmatpush3.bf16.msra.mxu0 %v4096_v15  ;;  %4169 = vmatprep.subr.bf16.mxu1 %v4168_v51  ;;  %v2885_v15 = vld [vmem:[%s5487_s3 + $0x140] sm:$0xff] }
 0x372   : > { %4101 = vmatprep.subr.bf16.mxu0 %v4100_v18  ;;  %v4140_v17 = vpack.c.bf16 %v2886_v16, %v2885_v15 }
 0x374   : > { %4171 = vmatpush3.bf16.msra.mxu1 %v4168_v51  ;;  %v2896_v51 = vld [vmem:[%s5492_s8 + $0x8] sm:$0xff] }
 0x375   : > { %4103 = vmatpush3.bf16.msra.mxu0 %v4100_v18  ;;  %4173 = vmatprep.subr.bf16.mxu1 %v4172_v55  ;;  %v2887_v18 = vld [vmem:[%s5487_s3 + $0x150] sm:$0xff] }
 0x376   : > { %4105 = vmatprep.subr.bf16.mxu0 %v4104_v21  ;;  %v4144_v20 = vpack.c.bf16 %v2888_v19, %v2887_v18  ;;  %v4219_v18 = vpack.c.bf16 %v2070_v13, %v2069_v12  ;;  %v2071_v19 = vld [vmem:[%s5491_s7 + $0x10] sm:$0xff]  ;;  %v2938_v12 = vld [vmem:[%s5491_s7 + $0x1a0] sm:$0xff]  ;;  %v2939_v13 = vld [vmem:[%s5491_s7 + $0x1a8] sm:$0xff] }
 0x378   : > { %4175 = vmatpush3.bf16.msra.mxu1 %v4172_v55  ;;  %v2900_v55 = vld [vmem:[%s5491_s7 + $0x90] sm:$0xff] }
 0x379   : > { %4107 = vmatpush3.bf16.msra.mxu0 %v4104_v21  ;;  %4177 = vmatprep.subr.bf16.mxu1 %v4176_v58  ;;  %v2889_v21 = vld [vmem:[%s5487_s3 + $0x160] sm:$0xff]  ;;  %v4198_v57 = vpack.c.bf16 %v2901_v56, %v2900_v55  ;;  %v2922_v55 = vld [vmem:[%s5491_s7 + $0x130] sm:$0xff]  ;;  %v2923_v56 = vld [vmem:[%s5491_s7 + $0x138] sm:$0xff] }
 0x37a   : > { %4109 = vmatprep.subr.bf16.mxu0 %v4108_v24  ;;  %v4148_v23 = vpack.c.bf16 %v2890_v22, %v2889_v21 }
 0x37c   : > { %4179 = vmatpush3.bf16.msra.mxu1 %v4176_v58  ;;  %v2902_v58 = vld [vmem:[%s5491_s7 + $0xa0] sm:$0xff] }
 0x37d   : > { %4111 = vmatpush3.bf16.msra.mxu0 %v4108_v24  ;;  %4181 = vmatprep.subr.bf16.mxu1 %v4180_v61  ;;  %v2891_v24 = vld [vmem:[%s5487_s3 + $0x170] sm:$0xff]  ;;  %v4201_v60 = vpack.c.bf16 %v2903_v59, %v2902_v58  ;;  %v2924_v58 = vld [vmem:[%s5491_s7 + $0x140] sm:$0xff]  ;;  %v2925_v59 = vld [vmem:[%s5491_s7 + $0x148] sm:$0xff] }
 0x37e   : > { %4113 = vmatprep.subr.bf16.mxu0 %v4112_v28  ;;  %v4152_v27 = vpack.c.bf16 %v2892_v26, %v2891_v24 }
 0x380   : > { %4183 = vmatpush3.bf16.msra.mxu1 %v4180_v61  ;;  %v2904_v61 = vld [vmem:[%s5491_s7 + $0xb0] sm:$0xff] }
 0x381   : > { %4115 = vmatpush3.bf16.msra.mxu0 %v4112_v28  ;;  %4185 = vmatprep.subr.bf16.mxu1 %v4184_v0  ;;  %v4204_v63 = vpack.c.bf16 %v2905_v62, %v2904_v61  ;;  %v2926_v61 = vld [vmem:[%s5491_s7 + $0x150] sm:$0xff]  ;;  %v2927_v62 = vld [vmem:[%s5491_s7 + $0x158] sm:$0xff] }
 0x382   : > { %4117 = vmatprep.subr.bf16.mxu0 %v4116_v32 }
 0x384   : > { %4187 = vmatpush3.bf16.msra.mxu1 %v4184_v0  ;;  %v2906_v0 = vld [vmem:[%s5491_s7 + $0xc0] sm:$0xff] }
 0x385   : > { %4119 = vmatpush3.bf16.msra.mxu0 %v4116_v32  ;;  %4188 = vmatprep.subr.bf16.mxu1 %v4335_v53 }
 0x386   : > { %4121 = vmatprep.subr.bf16.mxu0 %v4120_v35 }
 0x387   : > { %3642 = vmatmul.mubr.f32.vlgmr.msra.gmra.mrb[12].mxu1 %v4326_v1  ;;  %v2907_v1 = vld [vmem:[%s5491_s7 + $0xc8] sm:$0xff] }
 0x388   : > { %3648 = vmatprep.mubr.msk.f32.mxu1 %vm4336_vm2, %v4337_v25  ;;  %v4207_v2 = vpack.c.bf16 %v2907_v1, %v2906_v0  ;;  %v2928_v0 = vld [vmem:[%s5491_s7 + $0x160] sm:$0xff]  ;;  %v2929_v1 = vld [vmem:[%s5491_s7 + $0x168] sm:$0xff] }
 0x389   : > { %4123 = vmatpush3.bf16.msra.mxu0 %v4120_v35 }
 0x38a   : > { %4125 = vmatprep.subr.bf16.mxu0 %v4124_v38 }
 0x41f   : > { %v3496_v4 = vpop.f32.mrb[8].mxu0  ;;  %v3503_v5 = vpop.f32.mrb[10].mxu1 }
 0x420   : > { %v1507_v6 = vpop.f32.mrb[9].mxu0  ;;  %v1588_v8 = vpop.f32.mrb[11].mxu1 }
 0x421   : > { %3571 = vmatprep.mubr.f32.mxu0 %v1507_v6  ;;  %v2910_v6 = vld [vmem:[%s5491_s7 + $0xe0] sm:$0xff] }
 0x422   : > { %3572 = vmatmul.mubr.f32.vlgmr.msra.gmra.mrb[10].mxu0 %v3496_v4  ;;  %v2909_v4 = vld [vmem:[%s5491_s7 + $0xd8] sm:$0xff] }
 0x423   : > { %4127 = vmatpush3.bf16.msra.mxu0 %v4124_v38  ;;  %3606 = vmatprep.mubr.f32.mxu0 %v1588_v8 }
 0x424   : > { %4129 = vmatprep.subr.bf16.mxu0 %v4128_v7 }
 0x427   : > { %4131 = vmatpush3.bf16.msra.mxu0 %v4128_v7  ;;  %v2911_v7 = vld [vmem:[%s5491_s7 + $0xe8] sm:$0xff] }
 0x428   : > { %4133 = vmatprep.subr.bf16.mxu0 %v4132_v11  ;;  %v4213_v8 = vpack.c.bf16 %v2911_v7, %v2910_v6  ;;  %v2934_v6 = vld [vmem:[%s5491_s7 + $0x180] sm:$0xff]  ;;  %v2935_v7 = vld [vmem:[%s5491_s7 + $0x188] sm:$0xff] }
 0x42b   : > { %4135 = vmatpush3.bf16.msra.mxu0 %v4132_v11  ;;  %v4216_v11 = vpack.c.bf16 %v2913_v10, %v2912_v9  ;;  %v2936_v9 = vld [vmem:[%s5491_s7 + $0x190] sm:$0xff]  ;;  %v2937_v10 = vld [vmem:[%s5491_s7 + $0x198] sm:$0xff] }
 0x42c   : > { %4137 = vmatprep.subr.bf16.mxu0 %v4136_v14 }
 0x42f   : > { %4139 = vmatpush3.bf16.msra.mxu0 %v4136_v14 }
 0x430   : > { %4141 = vmatprep.subr.bf16.mxu0 %v4140_v17 }
 0x433   : > { %4143 = vmatpush3.bf16.msra.mxu0 %v4140_v17 }
 0x434   : > { %4145 = vmatprep.subr.bf16.mxu0 %v4144_v20 }
 0x437   : > { %4147 = vmatpush3.bf16.msra.mxu0 %v4144_v20  ;;  %v2072_v20 = vld [vmem:[%s5491_s7 + $0x18] sm:$0xff] }
 0x438   : > { %4149 = vmatprep.subr.bf16.mxu0 %v4148_v23  ;;  %v4222_v26 = vpack.c.bf16 %v2072_v20, %v2071_v19  ;;  %v2944_v20 = vld [vmem:[%s5491_s7 + $0x1d0] sm:$0xff] }
 0x43b   : > { %4151 = vmatpush3.bf16.msra.mxu0 %v4148_v23 }
 0x43c   : > { %4153 = vmatprep.subr.bf16.mxu0 %v4152_v27 }
 0x43f   : > { %4155 = vmatpush3.bf16.msra.mxu0 %v4152_v27  ;;  %v2073_v27 = vld [vmem:[%s5491_s7 + $0x20] sm:$0xff] }
 0x440   : > { %4242 = vmatprep.subr.bf16.mxu0 %v4335_v53 }
 0x442   : > { %3607 = vmatmul.mubr.f32.vlgmr.msra.gmra.mrb[10].mxu0 %v3503_v5  ;;  %v4210_v5 = vpack.c.bf16 %v2909_v4, %v2908_v3  ;;  %v2930_v3 = vld [vmem:[%s5491_s7 + $0x170] sm:$0xff]  ;;  %v2931_v4 = vld [vmem:[%s5491_s7 + $0x178] sm:$0xff] }
 0x443   : > { %3732 = vmatprep.mubr.msk.f32.mxu0 %vm4336_vm2, %v4337_v25 }
 0x45a   : > { %v3643_v28 = vpop.f32.mrb[12].mxu1 }
 0x45b   : > { %v1971_v30 = vpop.f32.mrb[13].mxu1 }
 0x515   : > { %v3608_v32 = vpop.f32.mrb[10].mxu0 }
 0x516   : > { %v1882_v33 = vadd.f32 %v3608_v32, %v2893_v31  ;;  %v1863_v34 = vpop.f32.mrb[11].mxu0  ;;  %v2076_v32 = vld [vmem:[%s5491_s7 + $0x38] sm:$0xff] }
 0x517   : > { %v1881_v35 = vadd.f32 %v2893_v31, %v1863_v34  ;;  %v2075_v31 = vld [vmem:[%s5491_s7 + $0x30] sm:$0xff]  ;;  %v2077_v34 = vld [vmem:[%s5491_s7 + $0x40] sm:$0xff] }
 0x518   : > { %v1886_v36 = vmul.f32 0.2, %v1882_v33  ;;  %vm1884_vm11 = vcmp.ge.f32.partialorder %v1882_v33, 0.0 }
 0x519   : > { %v1885_v37 = vmul.f32 0.2, %v1881_v35  ;;  %vm1883_vm12 = vcmp.ge.f32.partialorder %v1881_v35, 0.0 }
 0x51a   : > { %v1888_v38 = vsel %vm1884_vm11, %v1882_v33, %v1886_v36  ;;  %v4228_v33 = vpack.c.bf16 %v2076_v32, %v2075_v31 }
 0x51b   : > { %v1981_v39 = vadd.f32 %v3643_v28, %v1888_v38  ;;  %v1887_v40 = vsel %vm1883_vm12, %v1881_v35, %v1885_v37  ;;  %v2074_v28 = vld [vmem:[%s5491_s7 + $0x28] sm:$0xff]  ;;  %v2079_v37 = vld [vmem:[%s5491_s7 + $0x50] sm:$0xff]  ;;  %v2080_v38 = vld [vmem:[%s5491_s7 + $0x58] sm:$0xff] }
 0x51c   : > { %v1980_v42 = vadd.f32 %v1971_v30, %v1887_v40  ;;  %v4225_v30 = vpack.c.bf16 %v2074_v28, %v2073_v27  ;;  %v2078_v35 = vld [vmem:[%s5491_s7 + $0x48] sm:$0xff]  ;;  %v2081_v40 = vld [vmem:[%s5491_s7 + $0x60] sm:$0xff]  ;;  %v2948_v28 = vld [vmem:[%s5491_s7 + $0x1f0] sm:$0xff] }
 0x51d   : > { %v1983_v45 = vadd.f32 %v1981_v39, %v4986_v49  ;;  %v2914_v49 = vld [vmem:[%s5492_s8 + $0x10] sm:$0xff]  ;;  %v4231_v36 = vpack.c.bf16 %v2078_v35, %v2077_v34  ;;  %v4234_v39 = vpack.c.bf16 %v2080_v38, %v2079_v37 }
 0x51e   : > { %v1982_v43 = vadd.f32 %v1980_v42, %v4984_v46  ;;  %v2898_v46 = vld [vmem:[%s5491_s7 + $0x80] sm:$0xff] }
 0x51f   : > { %v1992_v47 = vadd.f32 %v2894_v41, %v1983_v45  ;;  %v4195_v54 = vpack.c.bf16 %v2899_v50, %v2898_v46  ;;  %v2083_v45 = vld [vmem:[%s5491_s7 + $0x70] sm:$0xff]  ;;  %v2919_v46 = vld [vmem:[%s5491_s7 + $0x118] sm:$0xff] }
 0x520   : > { %v1991_v48 = vadd.f32 %v2894_v41, %v1982_v43  ;;  %v2082_v41 = vld [vmem:[%s5491_s7 + $0x68] sm:$0xff]  ;;  %v2084_v43 = vld [vmem:[%s5491_s7 + $0x78] sm:$0xff] }
 0x521   : > { %1994 = vst [vmem:[%s521_s22 + $0x8] sm:$0xff] %v1992_v47  ;;  %v4237_v42 = vpack.c.bf16 %v2082_v41, %v2081_v40 }
 0x522   : > { %1993 = vst [vmem:[%s521_s22] sm:$0xff] %v1991_v48  ;;  %v4189_v44 = vpack.c.bf16 %v1992_v47, %v1991_v48  ;;  %v4240_v47 = vpack.c.bf16 %v2084_v43, %v2083_v45  ;;  %v2916_v48 = vld [vmem:[%s5491_s7 + $0x100] sm:$0xff] }
 0x524   : > { %4190 = vmatpush3.bf16.msra.mxu1 %v4189_v44  ;;  %4244 = vmatpush3.bf16.msra.mxu0 %v4189_v44 }
 0x525   : > { %4191 = vmatprep.subr.bf16.mxu1 %v4335_v53  ;;  %4269 = vmatprep.subr.bf16.mxu0 %v4335_v53 }
 0x527   : > { %3649 = vmatmul.mubr.msk.f32.vlgmr.msra.gmra.mrb[14].mxu1 %vm1434_vm4, %v1995_v29  ;;  %3733 = vmatmul.mubr.msk.f32.vlgmr.msra.gmra.mrb[12].mxu0 %vm1434_vm4, %v2914_v49  ;;  %v2918_v49 = vld [vmem:[%s5491_s7 + $0x110] sm:$0xff] }
 0x528   : > { %4193 = vmatpush3.bf16.msra.mxu1 %v4189_v44  ;;  %4271 = vmatpush3.bf16.msra.mxu0 %v4189_v44  ;;  %v2917_v44 = vld [vmem:[%s5491_s7 + $0x108] sm:$0xff]  ;;  %v4249_v50 = vpack.c.bf16 %v2919_v46, %v2918_v49 }
 0x529   : > { %3655 = vmatprep.mubr.msk.f32.mxu1 %vm4336_vm2, %v4337_v25  ;;  %3774 = vmatprep.mubr.msk.f32.mxu0 %vm4336_vm2, %v4337_v25  ;;  %v4246_v29 = vpack.c.bf16 %v2917_v44, %v2916_v48 }
 0x52a   : > { %4194 = vmatprep.subr.bf16.mxu1 %v4335_v53 }
 0x52b   : > { %3656 = vmatmul.mubr.msk.f32.vlgmr.msra.gmra.mrb[16].mxu1 %vm1434_vm4, %v2896_v51  ;;  %3775 = vmatmul.mubr.msk.f32.vlgmr.msra.gmra.mrb[14].mxu0 %vm1434_vm4, %v2932_v52  ;;  %v2920_v51 = vld [vmem:[%s5491_s7 + $0x120] sm:$0xff]  ;;  %v2921_v52 = vld [vmem:[%s5491_s7 + $0x128] sm:$0xff] }
 0x52c   : > { %4196 = vmatpush3.bf16.msra.mxu1 %v4195_v54  ;;  %3690 = vmatprep.mubr.msk.f32.mxu1 %vm4336_vm2, %v4337_v25  ;;  %v4252_v54 = vpack.c.bf16 %v2921_v52, %v2920_v51 }
 0x52d   : > { %4197 = vmatprep.subr.bf16.mxu1 %v4335_v53 }
 0x530   : > { %4199 = vmatpush3.bf16.msra.mxu1 %v4198_v57  ;;  %v4255_v57 = vpack.c.bf16 %v2923_v56, %v2922_v55 }
 0x531   : > { %4200 = vmatprep.subr.bf16.mxu1 %v4335_v53 }
 0x534   : > { %4202 = vmatpush3.bf16.msra.mxu1 %v4201_v60  ;;  %v4258_v60 = vpack.c.bf16 %v2925_v59, %v2924_v58 }
 0x535   : > { %4203 = vmatprep.subr.bf16.mxu1 %v4335_v53 }
 0x538   : > { %4205 = vmatpush3.bf16.msra.mxu1 %v4204_v63  ;;  %v4261_v63 = vpack.c.bf16 %v2927_v62, %v2926_v61 }
 0x539   : > { %4206 = vmatprep.subr.bf16.mxu1 %v4335_v53 }
 0x53c   : > { %4208 = vmatpush3.bf16.msra.mxu1 %v4207_v2  ;;  %v4264_v2 = vpack.c.bf16 %v2929_v1, %v2928_v0 }
 0x53d   : > { %4209 = vmatprep.subr.bf16.mxu1 %v4335_v53 }
 0x540   : > { %4211 = vmatpush3.bf16.msra.mxu1 %v4210_v5  ;;  %v4267_v5 = vpack.c.bf16 %v2931_v4, %v2930_v3 }
 0x541   : > { %4212 = vmatprep.subr.bf16.mxu1 %v4335_v53 }
 0x544   : > { %4214 = vmatpush3.bf16.msra.mxu1 %v4213_v8  ;;  %v4273_v8 = vpack.c.bf16 %v2935_v7, %v2934_v6 }
 0x545   : > { %4215 = vmatprep.subr.bf16.mxu1 %v4335_v53 }
 0x548   : > { %4217 = vmatpush3.bf16.msra.mxu1 %v4216_v11  ;;  %v4276_v11 = vpack.c.bf16 %v2937_v10, %v2936_v9 }
 0x549   : > { %4218 = vmatprep.subr.bf16.mxu1 %v4335_v53 }
 0x5fa   : > { %v2065_v14 = vpop.f32.mrb[14].mxu1  ;;  %v5304_v15 = vpop.f32.mrb[12].mxu0 }
 0x5fb   : > { %v3650_v16 = vpop.f32.mrb[15].mxu1  ;;  %v3734_v17 = vpop.f32.mrb[13].mxu0 }
 0x5fc   : > { %v2942_v17 = vld [vmem:[%s5491_s7 + $0x1c0] sm:$0xff] }
 0x5fe   : > { %v2156_v21 = vpop.f32.mrb[16].mxu1  ;;  %v5312_v22 = vpop.f32.mrb[14].mxu0 }
 0x5ff   : > { %v3657_v23 = vpop.f32.mrb[17].mxu1  ;;  %3691 = vmatmul.mubr.f32.vlgmr.msra.gmra.mrb[18].mxu1 %v2156_v21  ;;  %v3776_v24 = vpop.f32.mrb[15].mxu0  ;;  %v2945_v21 = vld [vmem:[%s5491_s7 + $0x1d8] sm:$0xff] }
 0x600   : > { %4220 = vmatpush3.bf16.msra.mxu1 %v4219_v18  ;;  %3725 = vmatprep.mubr.msk.f32.mxu1 %vm4336_vm2, %v4337_v25  ;;  %v2943_v18 = vld [vmem:[%s5491_s7 + $0x1c8] sm:$0xff]  ;;  %v4288_v23 = vpack.c.bf16 %v2945_v21, %v2944_v20  ;;  %v2946_v24 = vld [vmem:[%s5491_s7 + $0x1e0] sm:$0xff] }
 0x601   : > { %4221 = vmatprep.subr.bf16.mxu1 %v4335_v53  ;;  %v4285_v19 = vpack.c.bf16 %v2943_v18, %v2942_v17 }
 0x604   : > { %4223 = vmatpush3.bf16.msra.mxu1 %v4222_v26  ;;  %v2947_v26 = vld [vmem:[%s5491_s7 + $0x1e8] sm:$0xff] }
 0x605   : > { %4224 = vmatprep.subr.bf16.mxu1 %v4335_v53  ;;  %v4291_v27 = vpack.c.bf16 %v2947_v26, %v2946_v24 }
 0x608   : > { %4226 = vmatpush3.bf16.msra.mxu1 %v4225_v30  ;;  %v2949_v30 = vld [vmem:[%s5491_s7 + $0x1f8] sm:$0xff] }
 0x609   : > { %4227 = vmatprep.subr.bf16.mxu1 %v4335_v53  ;;  %v4294_v31 = vpack.c.bf16 %v2949_v30, %v2948_v28 }
 0x60c   : > { %4229 = vmatpush3.bf16.msra.mxu1 %v4228_v33 }
 0x60d   : > { %4230 = vmatprep.subr.bf16.mxu1 %v4335_v53 }
 0x610   : > { %4232 = vmatpush3.bf16.msra.mxu1 %v4231_v36 }
 0x611   : > { %4233 = vmatprep.subr.bf16.mxu1 %v4335_v53 }
 0x614   : > { %4235 = vmatpush3.bf16.msra.mxu1 %v4234_v39 }
 0x615   : > { %4236 = vmatprep.subr.bf16.mxu1 %v4335_v53 }
 0x618   : > { %4238 = vmatpush3.bf16.msra.mxu1 %v4237_v42 }
 0x619   : > { %4239 = vmatprep.subr.bf16.mxu1 %v4335_v53 }
 0x61c   : > { %4241 = vmatpush3.bf16.msra.mxu1 %v4240_v47 }
 0x61d   : > { %4245 = vmatprep.subr.bf16.mxu1 %v4335_v53 }
 0x61f   : > { %3726 = vmatmul.mubr.f32.vlgmr.msra.gmra.mrb[18].mxu1 %v2065_v14  ;;  %v4279_v14 = vpack.c.bf16 %v2939_v13, %v2938_v12 }
 0x620   : > { %4247 = vmatpush3.bf16.msra.mxu1 %v4246_v29  ;;  %3767 = vmatprep.mubr.msk.f32.mxu1 %vm4336_vm2, %v4337_v25 }
 0x621   : > { %4248 = vmatprep.subr.bf16.mxu1 %v4335_v53 }
 0x624   : > { %4250 = vmatpush3.bf16.msra.mxu1 %v4249_v50 }
 0x625   : > { %4251 = vmatprep.subr.bf16.mxu1 %v4335_v53 }
 0x628   : > { %4253 = vmatpush3.bf16.msra.mxu1 %v4252_v54 }
 0x629   : > { %4254 = vmatprep.subr.bf16.mxu1 %v4335_v53 }
 0x62c   : > { %4256 = vmatpush3.bf16.msra.mxu1 %v4255_v57 }
 0x62d   : > { %4257 = vmatprep.subr.bf16.mxu1 %v4335_v53 }
 0x630   : > { %4259 = vmatpush3.bf16.msra.mxu1 %v4258_v60 }
 0x631   : > { %4260 = vmatprep.subr.bf16.mxu1 %v4335_v53 }
 0x634   : > { %4262 = vmatpush3.bf16.msra.mxu1 %v4261_v63 }
 0x635   : > { %4263 = vmatprep.subr.bf16.mxu1 %v4335_v53 }
 0x638   : > { %4265 = vmatpush3.bf16.msra.mxu1 %v4264_v2 }
 0x639   : > { %4266 = vmatprep.subr.bf16.mxu1 %v4335_v53 }
 0x63c   : > { %4268 = vmatpush3.bf16.msra.mxu1 %v4267_v5 }
 0x63d   : > { %4272 = vmatprep.subr.bf16.mxu1 %v4335_v53 }
 0x63f   : > { %3768 = vmatmul.mubr.f32.vlgmr.msra.gmra.mrb[18].mxu1 %v5304_v15  ;;  %v2940_v15 = vld [vmem:[%s5491_s7 + $0x1b0] sm:$0xff] }
 0x640   : > { %4274 = vmatpush3.bf16.msra.mxu1 %v4273_v8  ;;  %3809 = vmatprep.mubr.msk.f32.mxu1 %vm4336_vm2, %v4337_v25  ;;  %v2941_v25 = vld [vmem:[%s5491_s7 + $0x1b8] sm:$0xff] }
 0x641   : > { %4275 = vmatprep.subr.bf16.mxu1 %v4335_v53  ;;  %v4282_v16 = vpack.c.bf16 %v2941_v25, %v2940_v15 }
 0x644   : > { %4277 = vmatpush3.bf16.msra.mxu1 %v4276_v11 }
 0x645   : > { %4278 = vmatprep.subr.bf16.mxu1 %v4335_v53 }
 0x648   : > { %4280 = vmatpush3.bf16.msra.mxu1 %v4279_v14 }
 0x649   : > { %4281 = vmatprep.subr.bf16.mxu1 %v4335_v53 }
 0x64c   : > { %4283 = vmatpush3.bf16.msra.mxu1 %v4282_v16 }
 0x64d   : > { %4284 = vmatprep.subr.bf16.mxu1 %v4335_v53 }
 0x650   : > { %4286 = vmatpush3.bf16.msra.mxu1 %v4285_v19 }
 0x651   : > { %4287 = vmatprep.subr.bf16.mxu1 %v4335_v53 }
 0x654   : > { %4289 = vmatpush3.bf16.msra.mxu1 %v4288_v23 }
 0x655   : > { %4290 = vmatprep.subr.bf16.mxu1 %v4335_v53 }
 0x658   : > { %4292 = vmatpush3.bf16.msra.mxu1 %v4291_v27 }
 0x659   : > { %4293 = vmatprep.subr.bf16.mxu1 %v4335_v53 }
 0x65c   : > { %4295 = vmatpush3.bf16.msra.mxu1 %v4294_v31 }
 0x65f   : > { %3810 = vmatmul.mubr.f32.vlgmr.msra.gmra.mrb[18].mxu1 %v5312_v22 }
 0x732   : > { %v2638_v32 = vpop.f32.mrb[18].mxu1 }
 0x733   : > { %2644 = vst.msk [vmem:[%s525_s20] sm:$0xff] %vm2643_vm13, %v2638_v32  ;;  %v3811_v33 = vpop.f32.mrb[19].mxu1 }
 0x734 PF: > { %s26_s18 = sadd.s32 1, %s4333_s18  }
 0x735   : > { %p23_p4 = scmp.ge.s32.totalorder %s26_s18, 4  }
 0x737   :  { %25 = sbr.rel (!%p23_p4) target bundleno = 1 (0x1), region = 133 }

</bundles_post_ra>
